<compile_context>
chip_gen: v5e
topology: v5e:2x2
jax: 0.10.0
libtpu: 0.0.40
codegen_flags: <defaults>
</compile_context>

<pallas_src>
import math

import jax
import jax.numpy as jnp
from jax.experimental import pallas as pl
from jax.experimental.pallas import tpu as pltpu  # noqa: F401  (kept for TPU-specific params if scaled up)

# ---------------- configuration (small, consistent with the module) ----------------
B = 2            # batch
L = 8            # configs.seq_len
CIN = 4          # configs.enc_in
D = 32           # configs.d_model
N_HEADS = 4      # configs.n_heads
DFF = 64         # configs.d_ff
CTX = 40         # ctx_projection = Linear(d_model + 40, d_model)  => outputs_ctx_tf is [B, 40]
E_LAYERS = 2     # configs.e_layers
NUM_CLASS = 5    # configs.num_class
CPAD = 8         # classifier output padded to 8 lanes only (sliced back to 5 in the wrapper)
EPS = 1e-5

# packed small-vector array row layout: 10 rows per layer, then [gamma_final, beta_final, bp]
_VROWS_PER_LAYER = 10
_R_BQ, _R_BK, _R_BV, _R_BO, _R_B2, _R_BC, _R_G1, _R_BE1, _R_G2, _R_BE2 = range(10)
_R_GF = E_LAYERS * _VROWS_PER_LAYER
_R_BF = _R_GF + 1
_R_BP = _R_GF + 2
_N_VROWS = _R_BP + 1


def _layer_norm(x, gamma, beta):
    mu = jnp.mean(x, axis=-1, keepdims=True)
    xc = x - mu
    var = jnp.mean(xc * xc, axis=-1, keepdims=True)
    return xc * jax.lax.rsqrt(var + EPS) * gamma + beta


# ---------------- fused forward kernel (embedding + encoder layers + head) ----------------
def fused_forward_kernel(xcat_ref, ctx_ref, pos_ref,
                         wtok_ref, wqkv_ref, wo_ref, w1_ref, w2_ref,
                         wc1_ref, wc2_ref, wp_ref, b1_ref, vecs_ref,
                         o_ref):
    f32 = jnp.float32
    bf16 = jnp.bfloat16

    def vec(r, width=D):
        return vecs_ref[r:r + 1, :width]                                  # (1, width) f32

    # ---- DataEmbedding: circular k=3 token conv (taps pre-gathered) + positional ----
    xcat = xcat_ref[...].astype(bf16)                                     # (B*L, 3*CIN)
    h = jnp.dot(xcat, wtok_ref[...], preferred_element_type=f32) + pos_ref[...]   # (B*L, D) f32

    # ---- hoisted, loop-invariant ctx projection for ALL layers (one matmul) ----
    ctx_all = jnp.dot(ctx_ref[...].astype(bf16), wc2_ref[...],
                      preferred_element_type=f32)                         # (B*L, E_LAYERS*D)

    e = D // N_HEADS
    scale = 1.0 / math.sqrt(e)

    # ---- E_LAYERS encoder layers (statically unrolled) ----
    for li in range(E_LAYERS):
        base = li * _VROWS_PER_LAYER

        # fused QKV projection: one (B*L, D) @ (D, 3D) matmul, lane-slice q/k/v
        qkv = jnp.dot(h.astype(bf16), wqkv_ref[li], preferred_element_type=f32)   # (B*L, 3D)
        q = (qkv[:, 0 * D:1 * D] + vec(base + _R_BQ)).reshape(B, L, D)
        k = (qkv[:, 1 * D:2 * D] + vec(base + _R_BK)).reshape(B, L, D)
        v = (qkv[:, 2 * D:3 * D] + vec(base + _R_BV)).reshape(B, L, D)

        # per-head attention; each head folded straight into the output projection
        # (no lane concat; accumulated on the MXU/VPU)
        wo_li = wo_ref[li]                                                # (D, D) bf16
        attn_acc = jnp.zeros((B * L, D), f32)
        for hh in range(N_HEADS):                                         # static unroll
            lo, hi = hh * e, (hh + 1) * e
            qh = q[:, :, lo:hi]
            kh = k[:, :, lo:hi]
            vh = v[:, :, lo:hi]
            s = jnp.einsum('ble,bme->blm', qh, kh,
                           preferred_element_type=f32) * scale            # (B, L, L) f32
            s = s - jnp.max(s, axis=-1, keepdims=True)
            p = jnp.exp(s)
            inv = pl.reciprocal(jnp.sum(p, axis=-1, keepdims=True), approx=True)  # (B, L, 1) on EUP
            oh = jnp.einsum('blm,bme->ble', p, vh,
                            preferred_element_type=f32) * inv             # normalize AFTER attn@V
            attn_acc = attn_acc + jnp.dot(oh.reshape(B * L, e).astype(bf16),
                                          wo_li[lo:hi, :],
                                          preferred_element_type=f32)
        new_x = attn_acc + vec(base + _R_BO)

        # residual + norm1
        xn = _layer_norm(h + new_x, vec(base + _R_G1), vec(base + _R_BE1))

        # k=1 conv FFN (== matmuls), relu activation
        y = jnp.dot(xn.astype(bf16), w1_ref[li], preferred_element_type=f32) + b1_ref[li]
        y = jnp.maximum(y, 0.0)
        y = jnp.dot(y.astype(bf16), w2_ref[li], preferred_element_type=f32) + vec(base + _R_B2)

        # ctx_projection(concat([y, ctx_rep], -1)) == y @ Wc[:D] + (ctx @ Wc[D:]) + bc
        # (ctx part hoisted to the prologue as ctx_all)
        y = (jnp.dot(y.astype(bf16), wc1_ref[li], preferred_element_type=f32)
             + ctx_all[:, li * D:(li + 1) * D] + vec(base + _R_BC))

        h = _layer_norm(xn + y, vec(base + _R_G2), vec(base + _R_BE2))

    # ---- final encoder LayerNorm + gelu + classifier (accumulated contraction over L) ----
    hn = _layer_norm(h, vec(_R_GF), vec(_R_BF))
    # TODO(synk): PyTorch F.gelu is erf-based; tanh approximation used here (erf has no clean Mosaic lowering).
    c0 = 0.7978845608028654
    g = 0.5 * hn * (1.0 + jnp.tanh(c0 * (hn + 0.044715 * hn * hn * hn)))  # (B*L, D) f32
    g3 = g.reshape(B, L, D)

    # logits[b, c] = sum_l sum_d g[b*L + l, d] * wp[l*D + d, c]   (torch flatten order l*D + d)
    acc = jnp.zeros((B, CPAD), f32)
    for t in range(L):                                                    # MXU-accumulated, no lane concat
        acc = acc + jnp.dot(g3[:, t, :].astype(bf16), wp_ref[t],
                            preferred_element_type=f32)
    logits = acc + vec(_R_BP, width=CPAD)                                 # (B, CPAD)
    o_ref[...] = logits.astype(o_ref.dtype)


# ---------------- glue: positional embedding, parameters, forward ----------------
def positional_embedding(l, d):
    pos = jnp.arange(l, dtype=jnp.float32)[:, None]
    div = jnp.exp(jnp.arange(0, d, 2, dtype=jnp.float32) * (-(math.log(10000.0) / d)))
    pe = jnp.zeros((l, d), jnp.float32)
    pe = pe.at[:, 0::2].set(jnp.sin(pos * div))
    pe = pe.at[:, 1::2].set(jnp.cos(pos * div))
    return pe


def init_params(key):
    keys = iter(jax.random.split(key, 64))

    def w(shape, scale=0.1):
        return (scale * jax.random.normal(next(keys), shape)).astype(jnp.float32)

    bf16 = jnp.bfloat16

    # Linear weights stored transposed ([in, out]); conv-k=1 layers are plain matmuls.
    wq, wk, wv = w((E_LAYERS, D, D)), w((E_LAYERS, D, D)), w((E_LAYERS, D, D))
    bq, bk, bv = w((E_LAYERS, D), 0.02), w((E_LAYERS, D), 0.02), w((E_LAYERS, D), 0.02)
    wo, bo = w((E_LAYERS, D, D)), w((E_LAYERS, D), 0.02)
    w1, b1 = w((E_LAYERS, D, DFF)), w((E_LAYERS, DFF), 0.02)
    w2, b2 = w((E_LAYERS, DFF, D)), w((E_LAYERS, D), 0.02)
    wc1, wc2, bc = w((E_LAYERS, D, D)), w((E_LAYERS, CTX, D)), w((E_LAYERS, D), 0.02)
    g1 = jnp.ones((E_LAYERS, D), jnp.float32)
    be1 = jnp.zeros((E_LAYERS, D), jnp.float32)
    g2 = jnp.ones((E_LAYERS, D), jnp.float32)
    be2 = jnp.zeros((E_LAYERS, D), jnp.float32)
    gf = jnp.ones((D,), jnp.float32)
    bfin = jnp.zeros((D,), jnp.float32)
    # TokenEmbedding Conv1d(k=3, bias=False): rows [0:CIN]=tap x[t-1], [CIN:2CIN]=x[t], [2CIN:3CIN]=x[t+1]
    wtok = w((3 * CIN, D))
    # classification projection Linear(L*D, NUM_CLASS), lane-padded only to CPAD=8
    wp = w((L * D, NUM_CLASS))
    bp = w((NUM_CLASS,), 0.02)

    # ---- packing / fusion for the kernel ----
    wqkv = jnp.concatenate([wq, wk, wv], axis=-1)                         # (E, D, 3D)
    wc2_all = jnp.moveaxis(wc2, 0, 1).reshape(CTX, E_LAYERS * D)          # (CTX, E*D): layer li -> lanes [li*D:(li+1)*D]
    wp_pad = jnp.concatenate([wp, jnp.zeros((L * D, CPAD - NUM_CLASS), jnp.float32)], axis=-1)
    wp3 = wp_pad.reshape(L, D, CPAD)                                      # row l*D+d -> wp3[l, d, :]
    bp_pad = jnp.concatenate([bp, jnp.zeros((CPAD - NUM_CLASS,), jnp.float32)])
    bp_row = jnp.pad(bp_pad, (0, D - CPAD))                               # widened to a (D,) row for the pack

    rows = []
    for li in range(E_LAYERS):
        rows += [bq[li], bk[li], bv[li], bo[li], b2[li], bc[li],
                 g1[li], be1[li], g2[li], be2[li]]
    rows += [gf, bfin, bp_row]
    vecs = jnp.stack(rows, axis=0)                                        # (_N_VROWS, D) f32
    assert vecs.shape == (_N_VROWS, D)

    return {
        # bf16 weights (halved DMA bytes); matmuls accumulate in f32 via preferred_element_type
        "wtok": wtok.astype(bf16),
        "wqkv": wqkv.astype(bf16),
        "wo": wo.astype(bf16),
        "w1": w1.astype(bf16),
        "w2": w2.astype(bf16),
        "wc1": wc1.astype(bf16),
        "wc2_all": wc2_all.astype(bf16),
        "wp3": wp3.astype(bf16),
        # f32 small vectors (elementwise math stays f32 on all generations)
        "b1": b1.reshape(E_LAYERS, 1, DFF),
        "vecs": vecs,
    }


def model_forward(x_enc, outputs_ctx_tf, params):
    b, l, cin = x_enc.shape
    # --- input layout plumbing (const-folded / fused by XLA under jit; single dispatch) ---
    pos_tiled = jnp.tile(positional_embedding(l, D), (b, 1))              # (B*L, D)
    ctx_tiled = jnp.repeat(outputs_ctx_tf, l, axis=0)                     # (B*L, CTX): row b*L+t == ctx[b]
    # circular conv taps: [x[(t-1) mod L] | x[t] | x[(t+1) mod L]] along the feature axis
    x_m1 = jnp.roll(x_enc, 1, axis=1)
    x_p1 = jnp.roll(x_enc, -1, axis=1)
    xcat = jnp.concatenate([x_m1, x_enc, x_p1], axis=-1).reshape(b * l, 3 * cin)

    out = pl.pallas_call(
        fused_forward_kernel,
        out_shape=jax.ShapeDtypeStruct((b, CPAD), jnp.float32),
    )(xcat, ctx_tiled, pos_tiled,
      params["wtok"], params["wqkv"], params["wo"], params["w1"], params["w2"],
      params["wc1"], params["wc2_all"], params["wp3"], params["b1"], params["vecs"])
    return out[:, :NUM_CLASS]


if __name__ == "__main__":
    key = jax.random.PRNGKey(0)
    k1, k2, k3 = jax.random.split(key, 3)
    x_enc = jax.random.normal(k1, (B, L, CIN), dtype=jnp.float32)
    outputs_ctx_tf = jax.random.normal(k2, (B, CTX), dtype=jnp.float32)
    params = init_params(k3)

    fwd = jax.jit(model_forward)
    out = fwd(x_enc, outputs_ctx_tf, params)
    jax.block_until_ready(out)
    assert out.shape == (B, NUM_CLASS), out.shape
    print("KERNEL_OK")
</pallas_src>

<mosaic_0001>
module attributes {stable_mosaic.version = 11 : i64} {
  func.func @fused_forward_kernel(%arg0: memref<16x12xf32, #tpu.memory_space<vmem>>, %arg1: memref<16x40xf32, #tpu.memory_space<vmem>>, %arg2: memref<16x32xf32, #tpu.memory_space<vmem>>, %arg3: memref<12x32xbf16, #tpu.memory_space<vmem>>, %arg4: memref<2x32x96xbf16, #tpu.memory_space<vmem>>, %arg5: memref<2x32x32xbf16, #tpu.memory_space<vmem>>, %arg6: memref<2x32x64xbf16, #tpu.memory_space<vmem>>, %arg7: memref<2x64x32xbf16, #tpu.memory_space<vmem>>, %arg8: memref<2x32x32xbf16, #tpu.memory_space<vmem>>, %arg9: memref<40x64xbf16, #tpu.memory_space<vmem>>, %arg10: memref<8x32x8xbf16, #tpu.memory_space<vmem>>, %arg11: memref<2x1x64xf32, #tpu.memory_space<vmem>>, %arg12: memref<23x32xf32, #tpu.memory_space<vmem>>, %arg13: memref<2x8xf32, #tpu.memory_space<vmem>>) attributes {dimension_semantics = [], scalar_prefetch = 0 : i64, scratch_operands = 0 : i64, tpu.core_type = #tpu.core_type<tc>} {
    %c0 = arith.constant 0 : index
    %c0_0 = arith.constant 0 : index
    %0 = vector.load %arg0[%c0, %c0_0] : memref<16x12xf32, #tpu.memory_space<vmem>>, vector<16x12xf32>
    %1 = arith.truncf %0 : vector<16x12xf32> to vector<16x12xbf16>
    %c0_1 = arith.constant 0 : index
    %c0_2 = arith.constant 0 : index
    %2 = vector.load %arg3[%c0_1, %c0_2] : memref<12x32xbf16, #tpu.memory_space<vmem>>, vector<12x32xbf16>
    %cst = arith.constant dense<0.000000e+00> : vector<16x32xf32>
    %3 = tpu.matmul %1, %2, %cst {dimension_numbers = #tpu.dot_dimension_numbers<[1], [0], [0], [1], [0, 0, 1, 1], [], []>} : vector<16x12xbf16>, vector<12x32xbf16>, vector<16x32xf32> -> vector<16x32xf32>
    %c0_3 = arith.constant 0 : index
    %c0_4 = arith.constant 0 : index
    %4 = vector.load %arg2[%c0_3, %c0_4] : memref<16x32xf32, #tpu.memory_space<vmem>>, vector<16x32xf32>
    %5 = arith.addf %3, %4 : vector<16x32xf32>
    %c0_5 = arith.constant 0 : index
    %c0_6 = arith.constant 0 : index
    %6 = vector.load %arg1[%c0_5, %c0_6] : memref<16x40xf32, #tpu.memory_space<vmem>>, vector<16x40xf32>
    %7 = arith.truncf %6 : vector<16x40xf32> to vector<16x40xbf16>
    %c0_7 = arith.constant 0 : index
    %c0_8 = arith.constant 0 : index
    %8 = vector.load %arg9[%c0_7, %c0_8] : memref<40x64xbf16, #tpu.memory_space<vmem>>, vector<40x64xbf16>
    %cst_9 = arith.constant dense<0.000000e+00> : vector<16x64xf32>
    %9 = tpu.matmul %7, %8, %cst_9 {dimension_numbers = #tpu.dot_dimension_numbers<[1], [0], [0], [1], [0, 0, 1, 1], [], []>} : vector<16x40xbf16>, vector<40x64xbf16>, vector<16x64xf32> -> vector<16x64xf32>
    %10 = arith.truncf %5 : vector<16x32xf32> to vector<16x32xbf16>
    %c0_10 = arith.constant 0 : index
    %c0_11 = arith.constant 0 : index
    %c0_12 = arith.constant 0 : index
    %11 = vector.load %arg4[%c0_10, %c0_11, %c0_12] : memref<2x32x96xbf16, #tpu.memory_space<vmem>>, vector<1x32x96xbf16>
    %12 = vector.shape_cast %11 : vector<1x32x96xbf16> to vector<32x96xbf16>
    %cst_13 = arith.constant dense<0.000000e+00> : vector<16x96xf32>
    %13 = tpu.matmul %10, %12, %cst_13 {dimension_numbers = #tpu.dot_dimension_numbers<[1], [0], [0], [1], [0, 0, 1, 1], [], []>} : vector<16x32xbf16>, vector<32x96xbf16>, vector<16x96xf32> -> vector<16x96xf32>
    %14 = vector.extract_strided_slice %13 {offsets = [0, 0], sizes = [16, 32], strides = [1, 1]} : vector<16x96xf32> to vector<16x32xf32>
    %c0_14 = arith.constant 0 : index
    %c0_15 = arith.constant 0 : index
    %15 = vector.load %arg12[%c0_14, %c0_15] : memref<23x32xf32, #tpu.memory_space<vmem>>, vector<1x32xf32>
    %16 = vector.broadcast %15 : vector<1x32xf32> to vector<16x32xf32>
    %17 = arith.addf %14, %16 : vector<16x32xf32>
    %18 = vector.shape_cast %17 : vector<16x32xf32> to vector<2x8x32xf32>
    %19 = vector.extract_strided_slice %13 {offsets = [0, 32], sizes = [16, 32], strides = [1, 1]} : vector<16x96xf32> to vector<16x32xf32>
    %c1 = arith.constant 1 : index
    %c0_16 = arith.constant 0 : index
    %20 = vector.load %arg12[%c1, %c0_16] : memref<23x32xf32, #tpu.memory_space<vmem>>, vector<1x32xf32>
    %21 = vector.broadcast %20 : vector<1x32xf32> to vector<16x32xf32>
    %22 = arith.addf %19, %21 : vector<16x32xf32>
    %23 = vector.shape_cast %22 : vector<16x32xf32> to vector<2x8x32xf32>
    %24 = vector.extract_strided_slice %13 {offsets = [0, 64], sizes = [16, 32], strides = [1, 1]} : vector<16x96xf32> to vector<16x32xf32>
    %c2 = arith.constant 2 : index
    %c0_17 = arith.constant 0 : index
    %25 = vector.load %arg12[%c2, %c0_17] : memref<23x32xf32, #tpu.memory_space<vmem>>, vector<1x32xf32>
    %26 = vector.broadcast %25 : vector<1x32xf32> to vector<16x32xf32>
    %27 = arith.addf %24, %26 : vector<16x32xf32>
    %28 = vector.shape_cast %27 : vector<16x32xf32> to vector<2x8x32xf32>
    %c0_18 = arith.constant 0 : index
    %c0_19 = arith.constant 0 : index
    %c0_20 = arith.constant 0 : index
    %29 = vector.load %arg5[%c0_18, %c0_19, %c0_20] : memref<2x32x32xbf16, #tpu.memory_space<vmem>>, vector<1x32x32xbf16>
    %30 = vector.shape_cast %29 : vector<1x32x32xbf16> to vector<32x32xbf16>
    %cst_21 = arith.constant 0.000000e+00 : f32
    %31 = vector.broadcast %cst_21 : f32 to vector<16x32xf32>
    %32 = vector.extract_strided_slice %18 {offsets = [0, 0, 0], sizes = [2, 8, 8], strides = [1, 1, 1]} : vector<2x8x32xf32> to vector<2x8x8xf32>
    %33 = vector.extract_strided_slice %23 {offsets = [0, 0, 0], sizes = [2, 8, 8], strides = [1, 1, 1]} : vector<2x8x32xf32> to vector<2x8x8xf32>
    %34 = vector.extract_strided_slice %28 {offsets = [0, 0, 0], sizes = [2, 8, 8], strides = [1, 1, 1]} : vector<2x8x32xf32> to vector<2x8x8xf32>
    "tpu.trace_start"() <{level = 10 : i32, message = "ble,bme->blm"}> : () -> ()
    %cst_22 = arith.constant dense<0.000000e+00> : vector<2x8x8xf32>
    %35 = tpu.matmul %32, %33, %cst_22 {dimension_numbers = #tpu.dot_dimension_numbers<[2], [2], [1], [1], [0, 0, 0, 1, 1, 1], [0], [0]>} : vector<2x8x8xf32>, vector<2x8x8xf32>, vector<2x8x8xf32> -> vector<2x8x8xf32>
    "tpu.trace_stop"() : () -> ()
    %cst_23 = arith.constant 0.353553385 : f32
    %36 = vector.broadcast %cst_23 : f32 to vector<2x8x8xf32>
    %37 = arith.mulf %35, %36 : vector<2x8x8xf32>
    %cst_24 = arith.constant dense<0xFF800000> : vector<2x8xf32>
    %38 = vector.multi_reduction <maximumf>, %37, %cst_24 [2] : vector<2x8x8xf32> to vector<2x8xf32>
    %39 = vector.shape_cast %38 : vector<2x8xf32> to vector<2x8x1xf32>
    %40 = vector.broadcast %39 : vector<2x8x1xf32> to vector<2x8x8xf32>
    %41 = arith.subf %37, %40 : vector<2x8x8xf32>
    %42 = math.exp %41 : vector<2x8x8xf32>
    %cst_25 = arith.constant dense<0.000000e+00> : vector<2x8xf32>
    %43 = vector.multi_reduction <add>, %42, %cst_25 [2] : vector<2x8x8xf32> to vector<2x8xf32>
    %44 = vector.shape_cast %43 : vector<2x8xf32> to vector<2x8x1xf32>
    %45 = tpu.reciprocal %44 {approx = true} : vector<2x8x1xf32> -> vector<2x8x1xf32>
    "tpu.trace_start"() <{level = 10 : i32, message = "blm,bme->ble"}> : () -> ()
    %cst_26 = arith.constant dense<0.000000e+00> : vector<2x8x8xf32>
    %46 = tpu.matmul %42, %34, %cst_26 {dimension_numbers = #tpu.dot_dimension_numbers<[2], [1], [1], [2], [0, 0, 0, 1, 1, 2], [0], [0]>} : vector<2x8x8xf32>, vector<2x8x8xf32>, vector<2x8x8xf32> -> vector<2x8x8xf32>
    "tpu.trace_stop"() : () -> ()
    %47 = vector.broadcast %45 : vector<2x8x1xf32> to vector<2x8x8xf32>
    %48 = arith.mulf %46, %47 : vector<2x8x8xf32>
    %49 = vector.shape_cast %48 : vector<2x8x8xf32> to vector<16x8xf32>
    %50 = arith.truncf %49 : vector<16x8xf32> to vector<16x8xbf16>
    %51 = vector.extract_strided_slice %30 {offsets = [0, 0], sizes = [8, 32], strides = [1, 1]} : vector<32x32xbf16> to vector<8x32xbf16>
    %cst_27 = arith.constant dense<0.000000e+00> : vector<16x32xf32>
    %52 = tpu.matmul %50, %51, %cst_27 {dimension_numbers = #tpu.dot_dimension_numbers<[1], [0], [0], [1], [0, 0, 1, 1], [], []>} : vector<16x8xbf16>, vector<8x32xbf16>, vector<16x32xf32> -> vector<16x32xf32>
    %53 = arith.addf %31, %52 : vector<16x32xf32>
    %54 = vector.extract_strided_slice %18 {offsets = [0, 0, 8], sizes = [2, 8, 8], strides = [1, 1, 1]} : vector<2x8x32xf32> to vector<2x8x8xf32>
    %55 = vector.extract_strided_slice %23 {offsets = [0, 0, 8], sizes = [2, 8, 8], strides = [1, 1, 1]} : vector<2x8x32xf32> to vector<2x8x8xf32>
    %56 = vector.extract_strided_slice %28 {offsets = [0, 0, 8], sizes = [2, 8, 8], strides = [1, 1, 1]} : vector<2x8x32xf32> to vector<2x8x8xf32>
    "tpu.trace_start"() <{level = 10 : i32, message = "ble,bme->blm"}> : () -> ()
    %cst_28 = arith.constant dense<0.000000e+00> : vector<2x8x8xf32>
    %57 = tpu.matmul %54, %55, %cst_28 {dimension_numbers = #tpu.dot_dimension_numbers<[2], [2], [1], [1], [0, 0, 0, 1, 1, 1], [0], [0]>} : vector<2x8x8xf32>, vector<2x8x8xf32>, vector<2x8x8xf32> -> vector<2x8x8xf32>
    "tpu.trace_stop"() : () -> ()
    %cst_29 = arith.constant 0.353553385 : f32
    %58 = vector.broadcast %cst_29 : f32 to vector<2x8x8xf32>
    %59 = arith.mulf %57, %58 : vector<2x8x8xf32>
    %cst_30 = arith.constant dense<0xFF800000> : vector<2x8xf32>
    %60 = vector.multi_reduction <maximumf>, %59, %cst_30 [2] : vector<2x8x8xf32> to vector<2x8xf32>
    %61 = vector.shape_cast %60 : vector<2x8xf32> to vector<2x8x1xf32>
    %62 = vector.broadcast %61 : vector<2x8x1xf32> to vector<2x8x8xf32>
    %63 = arith.subf %59, %62 : vector<2x8x8xf32>
    %64 = math.exp %63 : vector<2x8x8xf32>
    %cst_31 = arith.constant dense<0.000000e+00> : vector<2x8xf32>
    %65 = vector.multi_reduction <add>, %64, %cst_31 [2] : vector<2x8x8xf32> to vector<2x8xf32>
    %66 = vector.shape_cast %65 : vector<2x8xf32> to vector<2x8x1xf32>
    %67 = tpu.reciprocal %66 {approx = true} : vector<2x8x1xf32> -> vector<2x8x1xf32>
    "tpu.trace_start"() <{level = 10 : i32, message = "blm,bme->ble"}> : () -> ()
    %cst_32 = arith.constant dense<0.000000e+00> : vector<2x8x8xf32>
    %68 = tpu.matmul %64, %56, %cst_32 {dimension_numbers = #tpu.dot_dimension_numbers<[2], [1], [1], [2], [0, 0, 0, 1, 1, 2], [0], [0]>} : vector<2x8x8xf32>, vector<2x8x8xf32>, vector<2x8x8xf32> -> vector<2x8x8xf32>
    "tpu.trace_stop"() : () -> ()
    %69 = vector.broadcast %67 : vector<2x8x1xf32> to vector<2x8x8xf32>
    %70 = arith.mulf %68, %69 : vector<2x8x8xf32>
    %71 = vector.shape_cast %70 : vector<2x8x8xf32> to vector<16x8xf32>
    %72 = arith.truncf %71 : vector<16x8xf32> to vector<16x8xbf16>
    %73 = vector.extract_strided_slice %30 {offsets = [8, 0], sizes = [8, 32], strides = [1, 1]} : vector<32x32xbf16> to vector<8x32xbf16>
    %cst_33 = arith.constant dense<0.000000e+00> : vector<16x32xf32>
    %74 = tpu.matmul %72, %73, %cst_33 {dimension_numbers = #tpu.dot_dimension_numbers<[1], [0], [0], [1], [0, 0, 1, 1], [], []>} : vector<16x8xbf16>, vector<8x32xbf16>, vector<16x32xf32> -> vector<16x32xf32>
    %75 = arith.addf %53, %74 : vector<16x32xf32>
    %76 = vector.extract_strided_slice %18 {offsets = [0, 0, 16], sizes = [2, 8, 8], strides = [1, 1, 1]} : vector<2x8x32xf32> to vector<2x8x8xf32>
    %77 = vector.extract_strided_slice %23 {offsets = [0, 0, 16], sizes = [2, 8, 8], strides = [1, 1, 1]} : vector<2x8x32xf32> to vector<2x8x8xf32>
    %78 = vector.extract_strided_slice %28 {offsets = [0, 0, 16], sizes = [2, 8, 8], strides = [1, 1, 1]} : vector<2x8x32xf32> to vector<2x8x8xf32>
    "tpu.trace_start"() <{level = 10 : i32, message = "ble,bme->blm"}> : () -> ()
    %cst_34 = arith.constant dense<0.000000e+00> : vector<2x8x8xf32>
    %79 = tpu.matmul %76, %77, %cst_34 {dimension_numbers = #tpu.dot_dimension_numbers<[2], [2], [1], [1], [0, 0, 0, 1, 1, 1], [0], [0]>} : vector<2x8x8xf32>, vector<2x8x8xf32>, vector<2x8x8xf32> -> vector<2x8x8xf32>
    "tpu.trace_stop"() : () -> ()
    %cst_35 = arith.constant 0.353553385 : f32
    %80 = vector.broadcast %cst_35 : f32 to vector<2x8x8xf32>
    %81 = arith.mulf %79, %80 : vector<2x8x8xf32>
    %cst_36 = arith.constant dense<0xFF800000> : vector<2x8xf32>
    %82 = vector.multi_reduction <maximumf>, %81, %cst_36 [2] : vector<2x8x8xf32> to vector<2x8xf32>
    %83 = vector.shape_cast %82 : vector<2x8xf32> to vector<2x8x1xf32>
    %84 = vector.broadcast %83 : vector<2x8x1xf32> to vector<2x8x8xf32>
    %85 = arith.subf %81, %84 : vector<2x8x8xf32>
    %86 = math.exp %85 : vector<2x8x8xf32>
    %cst_37 = arith.constant dense<0.000000e+00> : vector<2x8xf32>
    %87 = vector.multi_reduction <add>, %86, %cst_37 [2] : vector<2x8x8xf32> to vector<2x8xf32>
    %88 = vector.shape_cast %87 : vector<2x8xf32> to vector<2x8x1xf32>
    %89 = tpu.reciprocal %88 {approx = true} : vector<2x8x1xf32> -> vector<2x8x1xf32>
    "tpu.trace_start"() <{level = 10 : i32, message = "blm,bme->ble"}> : () -> ()
    %cst_38 = arith.constant dense<0.000000e+00> : vector<2x8x8xf32>
    %90 = tpu.matmul %86, %78, %cst_38 {dimension_numbers = #tpu.dot_dimension_numbers<[2], [1], [1], [2], [0, 0, 0, 1, 1, 2], [0], [0]>} : vector<2x8x8xf32>, vector<2x8x8xf32>, vector<2x8x8xf32> -> vector<2x8x8xf32>
    "tpu.trace_stop"() : () -> ()
    %91 = vector.broadcast %89 : vector<2x8x1xf32> to vector<2x8x8xf32>
    %92 = arith.mulf %90, %91 : vector<2x8x8xf32>
    %93 = vector.shape_cast %92 : vector<2x8x8xf32> to vector<16x8xf32>
    %94 = arith.truncf %93 : vector<16x8xf32> to vector<16x8xbf16>
    %95 = vector.extract_strided_slice %30 {offsets = [16, 0], sizes = [8, 32], strides = [1, 1]} : vector<32x32xbf16> to vector<8x32xbf16>
    %cst_39 = arith.constant dense<0.000000e+00> : vector<16x32xf32>
    %96 = tpu.matmul %94, %95, %cst_39 {dimension_numbers = #tpu.dot_dimension_numbers<[1], [0], [0], [1], [0, 0, 1, 1], [], []>} : vector<16x8xbf16>, vector<8x32xbf16>, vector<16x32xf32> -> vector<16x32xf32>
    %97 = arith.addf %75, %96 : vector<16x32xf32>
    %98 = vector.extract_strided_slice %18 {offsets = [0, 0, 24], sizes = [2, 8, 8], strides = [1, 1, 1]} : vector<2x8x32xf32> to vector<2x8x8xf32>
    %99 = vector.extract_strided_slice %23 {offsets = [0, 0, 24], sizes = [2, 8, 8], strides = [1, 1, 1]} : vector<2x8x32xf32> to vector<2x8x8xf32>
    %100 = vector.extract_strided_slice %28 {offsets = [0, 0, 24], sizes = [2, 8, 8], strides = [1, 1, 1]} : vector<2x8x32xf32> to vector<2x8x8xf32>
    "tpu.trace_start"() <{level = 10 : i32, message = "ble,bme->blm"}> : () -> ()
    %cst_40 = arith.constant dense<0.000000e+00> : vector<2x8x8xf32>
    %101 = tpu.matmul %98, %99, %cst_40 {dimension_numbers = #tpu.dot_dimension_numbers<[2], [2], [1], [1], [0, 0, 0, 1, 1, 1], [0], [0]>} : vector<2x8x8xf32>, vector<2x8x8xf32>, vector<2x8x8xf32> -> vector<2x8x8xf32>
    "tpu.trace_stop"() : () -> ()
    %cst_41 = arith.constant 0.353553385 : f32
    %102 = vector.broadcast %cst_41 : f32 to vector<2x8x8xf32>
    %103 = arith.mulf %101, %102 : vector<2x8x8xf32>
    %cst_42 = arith.constant dense<0xFF800000> : vector<2x8xf32>
    %104 = vector.multi_reduction <maximumf>, %103, %cst_42 [2] : vector<2x8x8xf32> to vector<2x8xf32>
    %105 = vector.shape_cast %104 : vector<2x8xf32> to vector<2x8x1xf32>
    %106 = vector.broadcast %105 : vector<2x8x1xf32> to vector<2x8x8xf32>
    %107 = arith.subf %103, %106 : vector<2x8x8xf32>
    %108 = math.exp %107 : vector<2x8x8xf32>
    %cst_43 = arith.constant dense<0.000000e+00> : vector<2x8xf32>
    %109 = vector.multi_reduction <add>, %108, %cst_43 [2] : vector<2x8x8xf32> to vector<2x8xf32>
    %110 = vector.shape_cast %109 : vector<2x8xf32> to vector<2x8x1xf32>
    %111 = tpu.reciprocal %110 {approx = true} : vector<2x8x1xf32> -> vector<2x8x1xf32>
    "tpu.trace_start"() <{level = 10 : i32, message = "blm,bme->ble"}> : () -> ()
    %cst_44 = arith.constant dense<0.000000e+00> : vector<2x8x8xf32>
    %112 = tpu.matmul %108, %100, %cst_44 {dimension_numbers = #tpu.dot_dimension_numbers<[2], [1], [1], [2], [0, 0, 0, 1, 1, 2], [0], [0]>} : vector<2x8x8xf32>, vector<2x8x8xf32>, vector<2x8x8xf32> -> vector<2x8x8xf32>
    "tpu.trace_stop"() : () -> ()
    %113 = vector.broadcast %111 : vector<2x8x1xf32> to vector<2x8x8xf32>
    %114 = arith.mulf %112, %113 : vector<2x8x8xf32>
    %115 = vector.shape_cast %114 : vector<2x8x8xf32> to vector<16x8xf32>
    %116 = arith.truncf %115 : vector<16x8xf32> to vector<16x8xbf16>
    %117 = vector.extract_strided_slice %30 {offsets = [24, 0], sizes = [8, 32], strides = [1, 1]} : vector<32x32xbf16> to vector<8x32xbf16>
    %cst_45 = arith.constant dense<0.000000e+00> : vector<16x32xf32>
    %118 = tpu.matmul %116, %117, %cst_45 {dimension_numbers = #tpu.dot_dimension_numbers<[1], [0], [0], [1], [0, 0, 1, 1], [], []>} : vector<16x8xbf16>, vector<8x32xbf16>, vector<16x32xf32> -> vector<16x32xf32>
    %119 = arith.addf %97, %118 : vector<16x32xf32>
    %c3 = arith.constant 3 : index
    %c0_46 = arith.constant 0 : index
    %120 = vector.load %arg12[%c3, %c0_46] : memref<23x32xf32, #tpu.memory_space<vmem>>, vector<1x32xf32>
    %121 = vector.broadcast %120 : vector<1x32xf32> to vector<16x32xf32>
    %122 = arith.addf %119, %121 : vector<16x32xf32>
    %123 = arith.addf %5, %122 : vector<16x32xf32>
    %c6 = arith.constant 6 : index
    %c0_47 = arith.constant 0 : index
    %124 = vector.load %arg12[%c6, %c0_47] : memref<23x32xf32, #tpu.memory_space<vmem>>, vector<1x32xf32>
    %c7 = arith.constant 7 : index
    %c0_48 = arith.constant 0 : index
    %125 = vector.load %arg12[%c7, %c0_48] : memref<23x32xf32, #tpu.memory_space<vmem>>, vector<1x32xf32>
    %cst_49 = arith.constant dense<0.000000e+00> : vector<16xf32>
    %126 = vector.multi_reduction <add>, %123, %cst_49 [1] : vector<16x32xf32> to vector<16xf32>
    %127 = vector.shape_cast %126 : vector<16xf32> to vector<16x1xf32>
    %cst_50 = arith.constant 3.200000e+01 : f32
    %128 = vector.broadcast %cst_50 : f32 to vector<16x1xf32>
    %129 = arith.divf %127, %128 : vector<16x1xf32>
    %130 = vector.broadcast %129 : vector<16x1xf32> to vector<16x32xf32>
    %131 = arith.subf %123, %130 : vector<16x32xf32>
    %132 = arith.mulf %131, %131 : vector<16x32xf32>
    %cst_51 = arith.constant dense<0.000000e+00> : vector<16xf32>
    %133 = vector.multi_reduction <add>, %132, %cst_51 [1] : vector<16x32xf32> to vector<16xf32>
    %134 = vector.shape_cast %133 : vector<16xf32> to vector<16x1xf32>
    %cst_52 = arith.constant 3.200000e+01 : f32
    %135 = vector.broadcast %cst_52 : f32 to vector<16x1xf32>
    %136 = arith.divf %134, %135 : vector<16x1xf32>
    %cst_53 = arith.constant 9.99999974E-6 : f32
    %137 = vector.broadcast %cst_53 : f32 to vector<16x1xf32>
    %138 = arith.addf %136, %137 : vector<16x1xf32>
    %139 = math.rsqrt %138 : vector<16x1xf32>
    %140 = vector.broadcast %139 : vector<16x1xf32> to vector<16x32xf32>
    %141 = arith.mulf %131, %140 : vector<16x32xf32>
    %142 = vector.broadcast %124 : vector<1x32xf32> to vector<16x32xf32>
    %143 = arith.mulf %141, %142 : vector<16x32xf32>
    %144 = vector.broadcast %125 : vector<1x32xf32> to vector<16x32xf32>
    %145 = arith.addf %143, %144 : vector<16x32xf32>
    %146 = arith.truncf %145 : vector<16x32xf32> to vector<16x32xbf16>
    %c0_54 = arith.constant 0 : index
    %c0_55 = arith.constant 0 : index
    %c0_56 = arith.constant 0 : index
    %147 = vector.load %arg6[%c0_54, %c0_55, %c0_56] : memref<2x32x64xbf16, #tpu.memory_space<vmem>>, vector<1x32x64xbf16>
    %148 = vector.shape_cast %147 : vector<1x32x64xbf16> to vector<32x64xbf16>
    %cst_57 = arith.constant dense<0.000000e+00> : vector<16x64xf32>
    %149 = tpu.matmul %146, %148, %cst_57 {dimension_numbers = #tpu.dot_dimension_numbers<[1], [0], [0], [1], [0, 0, 1, 1], [], []>} : vector<16x32xbf16>, vector<32x64xbf16>, vector<16x64xf32> -> vector<16x64xf32>
    %c0_58 = arith.constant 0 : index
    %c0_59 = arith.constant 0 : index
    %c0_60 = arith.constant 0 : index
    %150 = vector.load %arg11[%c0_58, %c0_59, %c0_60] : memref<2x1x64xf32, #tpu.memory_space<vmem>>, vector<1x1x64xf32>
    %151 = vector.shape_cast %150 : vector<1x1x64xf32> to vector<1x64xf32>
    %152 = vector.broadcast %151 : vector<1x64xf32> to vector<16x64xf32>
    %153 = arith.addf %149, %152 : vector<16x64xf32>
    %cst_61 = arith.constant 0.000000e+00 : f32
    %154 = vector.broadcast %cst_61 : f32 to vector<16x64xf32>
    %155 = arith.maximumf %153, %154 : vector<16x64xf32>
    %156 = arith.truncf %155 : vector<16x64xf32> to vector<16x64xbf16>
    %c0_62 = arith.constant 0 : index
    %c0_63 = arith.constant 0 : index
    %c0_64 = arith.constant 0 : index
    %157 = vector.load %arg7[%c0_62, %c0_63, %c0_64] : memref<2x64x32xbf16, #tpu.memory_space<vmem>>, vector<1x64x32xbf16>
    %158 = vector.shape_cast %157 : vector<1x64x32xbf16> to vector<64x32xbf16>
    %cst_65 = arith.constant dense<0.000000e+00> : vector<16x32xf32>
    %159 = tpu.matmul %156, %158, %cst_65 {dimension_numbers = #tpu.dot_dimension_numbers<[1], [0], [0], [1], [0, 0, 1, 1], [], []>} : vector<16x64xbf16>, vector<64x32xbf16>, vector<16x32xf32> -> vector<16x32xf32>
    %c4 = arith.constant 4 : index
    %c0_66 = arith.constant 0 : index
    %160 = vector.load %arg12[%c4, %c0_66] : memref<23x32xf32, #tpu.memory_space<vmem>>, vector<1x32xf32>
    %161 = vector.broadcast %160 : vector<1x32xf32> to vector<16x32xf32>
    %162 = arith.addf %159, %161 : vector<16x32xf32>
    %163 = arith.truncf %162 : vector<16x32xf32> to vector<16x32xbf16>
    %c0_67 = arith.constant 0 : index
    %c0_68 = arith.constant 0 : index
    %c0_69 = arith.constant 0 : index
    %164 = vector.load %arg8[%c0_67, %c0_68, %c0_69] : memref<2x32x32xbf16, #tpu.memory_space<vmem>>, vector<1x32x32xbf16>
    %165 = vector.shape_cast %164 : vector<1x32x32xbf16> to vector<32x32xbf16>
    %cst_70 = arith.constant dense<0.000000e+00> : vector<16x32xf32>
    %166 = tpu.matmul %163, %165, %cst_70 {dimension_numbers = #tpu.dot_dimension_numbers<[1], [0], [0], [1], [0, 0, 1, 1], [], []>} : vector<16x32xbf16>, vector<32x32xbf16>, vector<16x32xf32> -> vector<16x32xf32>
    %167 = vector.extract_strided_slice %9 {offsets = [0, 0], sizes = [16, 32], strides = [1, 1]} : vector<16x64xf32> to vector<16x32xf32>
    %168 = arith.addf %166, %167 : vector<16x32xf32>
    %c5 = arith.constant 5 : index
    %c0_71 = arith.constant 0 : index
    %169 = vector.load %arg12[%c5, %c0_71] : memref<23x32xf32, #tpu.memory_space<vmem>>, vector<1x32xf32>
    %170 = vector.broadcast %169 : vector<1x32xf32> to vector<16x32xf32>
    %171 = arith.addf %168, %170 : vector<16x32xf32>
    %172 = arith.addf %145, %171 : vector<16x32xf32>
    %c8 = arith.constant 8 : index
    %c0_72 = arith.constant 0 : index
    %173 = vector.load %arg12[%c8, %c0_72] : memref<23x32xf32, #tpu.memory_space<vmem>>, vector<1x32xf32>
    %c9 = arith.constant 9 : index
    %c0_73 = arith.constant 0 : index
    %174 = vector.load %arg12[%c9, %c0_73] : memref<23x32xf32, #tpu.memory_space<vmem>>, vector<1x32xf32>
    %cst_74 = arith.constant dense<0.000000e+00> : vector<16xf32>
    %175 = vector.multi_reduction <add>, %172, %cst_74 [1] : vector<16x32xf32> to vector<16xf32>
    %176 = vector.shape_cast %175 : vector<16xf32> to vector<16x1xf32>
    %cst_75 = arith.constant 3.200000e+01 : f32
    %177 = vector.broadcast %cst_75 : f32 to vector<16x1xf32>
    %178 = arith.divf %176, %177 : vector<16x1xf32>
    %179 = vector.broadcast %178 : vector<16x1xf32> to vector<16x32xf32>
    %180 = arith.subf %172, %179 : vector<16x32xf32>
    %181 = arith.mulf %180, %180 : vector<16x32xf32>
    %cst_76 = arith.constant dense<0.000000e+00> : vector<16xf32>
    %182 = vector.multi_reduction <add>, %181, %cst_76 [1] : vector<16x32xf32> to vector<16xf32>
    %183 = vector.shape_cast %182 : vector<16xf32> to vector<16x1xf32>
    %cst_77 = arith.constant 3.200000e+01 : f32
    %184 = vector.broadcast %cst_77 : f32 to vector<16x1xf32>
    %185 = arith.divf %183, %184 : vector<16x1xf32>
    %cst_78 = arith.constant 9.99999974E-6 : f32
    %186 = vector.broadcast %cst_78 : f32 to vector<16x1xf32>
    %187 = arith.addf %185, %186 : vector<16x1xf32>
    %188 = math.rsqrt %187 : vector<16x1xf32>
    %189 = vector.broadcast %188 : vector<16x1xf32> to vector<16x32xf32>
    %190 = arith.mulf %180, %189 : vector<16x32xf32>
    %191 = vector.broadcast %173 : vector<1x32xf32> to vector<16x32xf32>
    %192 = arith.mulf %190, %191 : vector<16x32xf32>
    %193 = vector.broadcast %174 : vector<1x32xf32> to vector<16x32xf32>
    %194 = arith.addf %192, %193 : vector<16x32xf32>
    %195 = arith.truncf %194 : vector<16x32xf32> to vector<16x32xbf16>
    %c1_79 = arith.constant 1 : index
    %c0_80 = arith.constant 0 : index
    %c0_81 = arith.constant 0 : index
    %196 = vector.load %arg4[%c1_79, %c0_80, %c0_81] : memref<2x32x96xbf16, #tpu.memory_space<vmem>>, vector<1x32x96xbf16>
    %197 = vector.shape_cast %196 : vector<1x32x96xbf16> to vector<32x96xbf16>
    %cst_82 = arith.constant dense<0.000000e+00> : vector<16x96xf32>
    %198 = tpu.matmul %195, %197, %cst_82 {dimension_numbers = #tpu.dot_dimension_numbers<[1], [0], [0], [1], [0, 0, 1, 1], [], []>} : vector<16x32xbf16>, vector<32x96xbf16>, vector<16x96xf32> -> vector<16x96xf32>
    %199 = vector.extract_strided_slice %198 {offsets = [0, 0], sizes = [16, 32], strides = [1, 1]} : vector<16x96xf32> to vector<16x32xf32>
    %c10 = arith.constant 10 : index
    %c0_83 = arith.constant 0 : index
    %200 = vector.load %arg12[%c10, %c0_83] : memref<23x32xf32, #tpu.memory_space<vmem>>, vector<1x32xf32>
    %201 = vector.broadcast %200 : vector<1x32xf32> to vector<16x32xf32>
    %202 = arith.addf %199, %201 : vector<16x32xf32>
    %203 = vector.shape_cast %202 : vector<16x32xf32> to vector<2x8x32xf32>
    %204 = vector.extract_strided_slice %198 {offsets = [0, 32], sizes = [16, 32], strides = [1, 1]} : vector<16x96xf32> to vector<16x32xf32>
    %c11 = arith.constant 11 : index
    %c0_84 = arith.constant 0 : index
    %205 = vector.load %arg12[%c11, %c0_84] : memref<23x32xf32, #tpu.memory_space<vmem>>, vector<1x32xf32>
    %206 = vector.broadcast %205 : vector<1x32xf32> to vector<16x32xf32>
    %207 = arith.addf %204, %206 : vector<16x32xf32>
    %208 = vector.shape_cast %207 : vector<16x32xf32> to vector<2x8x32xf32>
    %209 = vector.extract_strided_slice %198 {offsets = [0, 64], sizes = [16, 32], strides = [1, 1]} : vector<16x96xf32> to vector<16x32xf32>
    %c12 = arith.constant 12 : index
    %c0_85 = arith.constant 0 : index
    %210 = vector.load %arg12[%c12, %c0_85] : memref<23x32xf32, #tpu.memory_space<vmem>>, vector<1x32xf32>
    %211 = vector.broadcast %210 : vector<1x32xf32> to vector<16x32xf32>
    %212 = arith.addf %209, %211 : vector<16x32xf32>
    %213 = vector.shape_cast %212 : vector<16x32xf32> to vector<2x8x32xf32>
    %c1_86 = arith.constant 1 : index
    %c0_87 = arith.constant 0 : index
    %c0_88 = arith.constant 0 : index
    %214 = vector.load %arg5[%c1_86, %c0_87, %c0_88] : memref<2x32x32xbf16, #tpu.memory_space<vmem>>, vector<1x32x32xbf16>
    %215 = vector.shape_cast %214 : vector<1x32x32xbf16> to vector<32x32xbf16>
    %cst_89 = arith.constant 0.000000e+00 : f32
    %216 = vector.broadcast %cst_89 : f32 to vector<16x32xf32>
    %217 = vector.extract_strided_slice %203 {offsets = [0, 0, 0], sizes = [2, 8, 8], strides = [1, 1, 1]} : vector<2x8x32xf32> to vector<2x8x8xf32>
    %218 = vector.extract_strided_slice %208 {offsets = [0, 0, 0], sizes = [2, 8, 8], strides = [1, 1, 1]} : vector<2x8x32xf32> to vector<2x8x8xf32>
    %219 = vector.extract_strided_slice %213 {offsets = [0, 0, 0], sizes = [2, 8, 8], strides = [1, 1, 1]} : vector<2x8x32xf32> to vector<2x8x8xf32>
    "tpu.trace_start"() <{level = 10 : i32, message = "ble,bme->blm"}> : () -> ()
    %cst_90 = arith.constant dense<0.000000e+00> : vector<2x8x8xf32>
    %220 = tpu.matmul %217, %218, %cst_90 {dimension_numbers = #tpu.dot_dimension_numbers<[2], [2], [1], [1], [0, 0, 0, 1, 1, 1], [0], [0]>} : vector<2x8x8xf32>, vector<2x8x8xf32>, vector<2x8x8xf32> -> vector<2x8x8xf32>
    "tpu.trace_stop"() : () -> ()
    %cst_91 = arith.constant 0.353553385 : f32
    %221 = vector.broadcast %cst_91 : f32 to vector<2x8x8xf32>
    %222 = arith.mulf %220, %221 : vector<2x8x8xf32>
    %cst_92 = arith.constant dense<0xFF800000> : vector<2x8xf32>
    %223 = vector.multi_reduction <maximumf>, %222, %cst_92 [2] : vector<2x8x8xf32> to vector<2x8xf32>
    %224 = vector.shape_cast %223 : vector<2x8xf32> to vector<2x8x1xf32>
    %225 = vector.broadcast %224 : vector<2x8x1xf32> to vector<2x8x8xf32>
    %226 = arith.subf %222, %225 : vector<2x8x8xf32>
    %227 = math.exp %226 : vector<2x8x8xf32>
    %cst_93 = arith.constant dense<0.000000e+00> : vector<2x8xf32>
    %228 = vector.multi_reduction <add>, %227, %cst_93 [2] : vector<2x8x8xf32> to vector<2x8xf32>
    %229 = vector.shape_cast %228 : vector<2x8xf32> to vector<2x8x1xf32>
    %230 = tpu.reciprocal %229 {approx = true} : vector<2x8x1xf32> -> vector<2x8x1xf32>
    "tpu.trace_start"() <{level = 10 : i32, message = "blm,bme->ble"}> : () -> ()
    %cst_94 = arith.constant dense<0.000000e+00> : vector<2x8x8xf32>
    %231 = tpu.matmul %227, %219, %cst_94 {dimension_numbers = #tpu.dot_dimension_numbers<[2], [1], [1], [2], [0, 0, 0, 1, 1, 2], [0], [0]>} : vector<2x8x8xf32>, vector<2x8x8xf32>, vector<2x8x8xf32> -> vector<2x8x8xf32>
    "tpu.trace_stop"() : () -> ()
    %232 = vector.broadcast %230 : vector<2x8x1xf32> to vector<2x8x8xf32>
    %233 = arith.mulf %231, %232 : vector<2x8x8xf32>
    %234 = vector.shape_cast %233 : vector<2x8x8xf32> to vector<16x8xf32>
    %235 = arith.truncf %234 : vector<16x8xf32> to vector<16x8xbf16>
    %236 = vector.extract_strided_slice %215 {offsets = [0, 0], sizes = [8, 32], strides = [1, 1]} : vector<32x32xbf16> to vector<8x32xbf16>
    %cst_95 = arith.constant dense<0.000000e+00> : vector<16x32xf32>
    %237 = tpu.matmul %235, %236, %cst_95 {dimension_numbers = #tpu.dot_dimension_numbers<[1], [0], [0], [1], [0, 0, 1, 1], [], []>} : vector<16x8xbf16>, vector<8x32xbf16>, vector<16x32xf32> -> vector<16x32xf32>
    %238 = arith.addf %216, %237 : vector<16x32xf32>
    %239 = vector.extract_strided_slice %203 {offsets = [0, 0, 8], sizes = [2, 8, 8], strides = [1, 1, 1]} : vector<2x8x32xf32> to vector<2x8x8xf32>
    %240 = vector.extract_strided_slice %208 {offsets = [0, 0, 8], sizes = [2, 8, 8], strides = [1, 1, 1]} : vector<2x8x32xf32> to vector<2x8x8xf32>
    %241 = vector.extract_strided_slice %213 {offsets = [0, 0, 8], sizes = [2, 8, 8], strides = [1, 1, 1]} : vector<2x8x32xf32> to vector<2x8x8xf32>
    "tpu.trace_start"() <{level = 10 : i32, message = "ble,bme->blm"}> : () -> ()
    %cst_96 = arith.constant dense<0.000000e+00> : vector<2x8x8xf32>
    %242 = tpu.matmul %239, %240, %cst_96 {dimension_numbers = #tpu.dot_dimension_numbers<[2], [2], [1], [1], [0, 0, 0, 1, 1, 1], [0], [0]>} : vector<2x8x8xf32>, vector<2x8x8xf32>, vector<2x8x8xf32> -> vector<2x8x8xf32>
    "tpu.trace_stop"() : () -> ()
    %cst_97 = arith.constant 0.353553385 : f32
    %243 = vector.broadcast %cst_97 : f32 to vector<2x8x8xf32>
    %244 = arith.mulf %242, %243 : vector<2x8x8xf32>
    %cst_98 = arith.constant dense<0xFF800000> : vector<2x8xf32>
    %245 = vector.multi_reduction <maximumf>, %244, %cst_98 [2] : vector<2x8x8xf32> to vector<2x8xf32>
    %246 = vector.shape_cast %245 : vector<2x8xf32> to vector<2x8x1xf32>
    %247 = vector.broadcast %246 : vector<2x8x1xf32> to vector<2x8x8xf32>
    %248 = arith.subf %244, %247 : vector<2x8x8xf32>
    %249 = math.exp %248 : vector<2x8x8xf32>
    %cst_99 = arith.constant dense<0.000000e+00> : vector<2x8xf32>
    %250 = vector.multi_reduction <add>, %249, %cst_99 [2] : vector<2x8x8xf32> to vector<2x8xf32>
    %251 = vector.shape_cast %250 : vector<2x8xf32> to vector<2x8x1xf32>
    %252 = tpu.reciprocal %251 {approx = true} : vector<2x8x1xf32> -> vector<2x8x1xf32>
    "tpu.trace_start"() <{level = 10 : i32, message = "blm,bme->ble"}> : () -> ()
    %cst_100 = arith.constant dense<0.000000e+00> : vector<2x8x8xf32>
    %253 = tpu.matmul %249, %241, %cst_100 {dimension_numbers = #tpu.dot_dimension_numbers<[2], [1], [1], [2], [0, 0, 0, 1, 1, 2], [0], [0]>} : vector<2x8x8xf32>, vector<2x8x8xf32>, vector<2x8x8xf32> -> vector<2x8x8xf32>
    "tpu.trace_stop"() : () -> ()
    %254 = vector.broadcast %252 : vector<2x8x1xf32> to vector<2x8x8xf32>
    %255 = arith.mulf %253, %254 : vector<2x8x8xf32>
    %256 = vector.shape_cast %255 : vector<2x8x8xf32> to vector<16x8xf32>
    %257 = arith.truncf %256 : vector<16x8xf32> to vector<16x8xbf16>
    %258 = vector.extract_strided_slice %215 {offsets = [8, 0], sizes = [8, 32], strides = [1, 1]} : vector<32x32xbf16> to vector<8x32xbf16>
    %cst_101 = arith.constant dense<0.000000e+00> : vector<16x32xf32>
    %259 = tpu.matmul %257, %258, %cst_101 {dimension_numbers = #tpu.dot_dimension_numbers<[1], [0], [0], [1], [0, 0, 1, 1], [], []>} : vector<16x8xbf16>, vector<8x32xbf16>, vector<16x32xf32> -> vector<16x32xf32>
    %260 = arith.addf %238, %259 : vector<16x32xf32>
    %261 = vector.extract_strided_slice %203 {offsets = [0, 0, 16], sizes = [2, 8, 8], strides = [1, 1, 1]} : vector<2x8x32xf32> to vector<2x8x8xf32>
    %262 = vector.extract_strided_slice %208 {offsets = [0, 0, 16], sizes = [2, 8, 8], strides = [1, 1, 1]} : vector<2x8x32xf32> to vector<2x8x8xf32>
    %263 = vector.extract_strided_slice %213 {offsets = [0, 0, 16], sizes = [2, 8, 8], strides = [1, 1, 1]} : vector<2x8x32xf32> to vector<2x8x8xf32>
    "tpu.trace_start"() <{level = 10 : i32, message = "ble,bme->blm"}> : () -> ()
    %cst_102 = arith.constant dense<0.000000e+00> : vector<2x8x8xf32>
    %264 = tpu.matmul %261, %262, %cst_102 {dimension_numbers = #tpu.dot_dimension_numbers<[2], [2], [1], [1], [0, 0, 0, 1, 1, 1], [0], [0]>} : vector<2x8x8xf32>, vector<2x8x8xf32>, vector<2x8x8xf32> -> vector<2x8x8xf32>
    "tpu.trace_stop"() : () -> ()
    %cst_103 = arith.constant 0.353553385 : f32
    %265 = vector.broadcast %cst_103 : f32 to vector<2x8x8xf32>
    %266 = arith.mulf %264, %265 : vector<2x8x8xf32>
    %cst_104 = arith.constant dense<0xFF800000> : vector<2x8xf32>
    %267 = vector.multi_reduction <maximumf>, %266, %cst_104 [2] : vector<2x8x8xf32> to vector<2x8xf32>
    %268 = vector.shape_cast %267 : vector<2x8xf32> to vector<2x8x1xf32>
    %269 = vector.broadcast %268 : vector<2x8x1xf32> to vector<2x8x8xf32>
    %270 = arith.subf %266, %269 : vector<2x8x8xf32>
    %271 = math.exp %270 : vector<2x8x8xf32>
    %cst_105 = arith.constant dense<0.000000e+00> : vector<2x8xf32>
    %272 = vector.multi_reduction <add>, %271, %cst_105 [2] : vector<2x8x8xf32> to vector<2x8xf32>
    %273 = vector.shape_cast %272 : vector<2x8xf32> to vector<2x8x1xf32>
    %274 = tpu.reciprocal %273 {approx = true} : vector<2x8x1xf32> -> vector<2x8x1xf32>
    "tpu.trace_start"() <{level = 10 : i32, message = "blm,bme->ble"}> : () -> ()
    %cst_106 = arith.constant dense<0.000000e+00> : vector<2x8x8xf32>
    %275 = tpu.matmul %271, %263, %cst_106 {dimension_numbers = #tpu.dot_dimension_numbers<[2], [1], [1], [2], [0, 0, 0, 1, 1, 2], [0], [0]>} : vector<2x8x8xf32>, vector<2x8x8xf32>, vector<2x8x8xf32> -> vector<2x8x8xf32>
    "tpu.trace_stop"() : () -> ()
    %276 = vector.broadcast %274 : vector<2x8x1xf32> to vector<2x8x8xf32>
    %277 = arith.mulf %275, %276 : vector<2x8x8xf32>
    %278 = vector.shape_cast %277 : vector<2x8x8xf32> to vector<16x8xf32>
    %279 = arith.truncf %278 : vector<16x8xf32> to vector<16x8xbf16>
    %280 = vector.extract_strided_slice %215 {offsets = [16, 0], sizes = [8, 32], strides = [1, 1]} : vector<32x32xbf16> to vector<8x32xbf16>
    %cst_107 = arith.constant dense<0.000000e+00> : vector<16x32xf32>
    %281 = tpu.matmul %279, %280, %cst_107 {dimension_numbers = #tpu.dot_dimension_numbers<[1], [0], [0], [1], [0, 0, 1, 1], [], []>} : vector<16x8xbf16>, vector<8x32xbf16>, vector<16x32xf32> -> vector<16x32xf32>
    %282 = arith.addf %260, %281 : vector<16x32xf32>
    %283 = vector.extract_strided_slice %203 {offsets = [0, 0, 24], sizes = [2, 8, 8], strides = [1, 1, 1]} : vector<2x8x32xf32> to vector<2x8x8xf32>
    %284 = vector.extract_strided_slice %208 {offsets = [0, 0, 24], sizes = [2, 8, 8], strides = [1, 1, 1]} : vector<2x8x32xf32> to vector<2x8x8xf32>
    %285 = vector.extract_strided_slice %213 {offsets = [0, 0, 24], sizes = [2, 8, 8], strides = [1, 1, 1]} : vector<2x8x32xf32> to vector<2x8x8xf32>
    "tpu.trace_start"() <{level = 10 : i32, message = "ble,bme->blm"}> : () -> ()
    %cst_108 = arith.constant dense<0.000000e+00> : vector<2x8x8xf32>
    %286 = tpu.matmul %283, %284, %cst_108 {dimension_numbers = #tpu.dot_dimension_numbers<[2], [2], [1], [1], [0, 0, 0, 1, 1, 1], [0], [0]>} : vector<2x8x8xf32>, vector<2x8x8xf32>, vector<2x8x8xf32> -> vector<2x8x8xf32>
    "tpu.trace_stop"() : () -> ()
    %cst_109 = arith.constant 0.353553385 : f32
    %287 = vector.broadcast %cst_109 : f32 to vector<2x8x8xf32>
    %288 = arith.mulf %286, %287 : vector<2x8x8xf32>
    %cst_110 = arith.constant dense<0xFF800000> : vector<2x8xf32>
    %289 = vector.multi_reduction <maximumf>, %288, %cst_110 [2] : vector<2x8x8xf32> to vector<2x8xf32>
    %290 = vector.shape_cast %289 : vector<2x8xf32> to vector<2x8x1xf32>
    %291 = vector.broadcast %290 : vector<2x8x1xf32> to vector<2x8x8xf32>
    %292 = arith.subf %288, %291 : vector<2x8x8xf32>
    %293 = math.exp %292 : vector<2x8x8xf32>
    %cst_111 = arith.constant dense<0.000000e+00> : vector<2x8xf32>
    %294 = vector.multi_reduction <add>, %293, %cst_111 [2] : vector<2x8x8xf32> to vector<2x8xf32>
    %295 = vector.shape_cast %294 : vector<2x8xf32> to vector<2x8x1xf32>
    %296 = tpu.reciprocal %295 {approx = true} : vector<2x8x1xf32> -> vector<2x8x1xf32>
    "tpu.trace_start"() <{level = 10 : i32, message = "blm,bme->ble"}> : () -> ()
    %cst_112 = arith.constant dense<0.000000e+00> : vector<2x8x8xf32>
    %297 = tpu.matmul %293, %285, %cst_112 {dimension_numbers = #tpu.dot_dimension_numbers<[2], [1], [1], [2], [0, 0, 0, 1, 1, 2], [0], [0]>} : vector<2x8x8xf32>, vector<2x8x8xf32>, vector<2x8x8xf32> -> vector<2x8x8xf32>
    "tpu.trace_stop"() : () -> ()
    %298 = vector.broadcast %296 : vector<2x8x1xf32> to vector<2x8x8xf32>
    %299 = arith.mulf %297, %298 : vector<2x8x8xf32>
    %300 = vector.shape_cast %299 : vector<2x8x8xf32> to vector<16x8xf32>
    %301 = arith.truncf %300 : vector<16x8xf32> to vector<16x8xbf16>
    %302 = vector.extract_strided_slice %215 {offsets = [24, 0], sizes = [8, 32], strides = [1, 1]} : vector<32x32xbf16> to vector<8x32xbf16>
    %cst_113 = arith.constant dense<0.000000e+00> : vector<16x32xf32>
    %303 = tpu.matmul %301, %302, %cst_113 {dimension_numbers = #tpu.dot_dimension_numbers<[1], [0], [0], [1], [0, 0, 1, 1], [], []>} : vector<16x8xbf16>, vector<8x32xbf16>, vector<16x32xf32> -> vector<16x32xf32>
    %304 = arith.addf %282, %303 : vector<16x32xf32>
    %c13 = arith.constant 13 : index
    %c0_114 = arith.constant 0 : index
    %305 = vector.load %arg12[%c13, %c0_114] : memref<23x32xf32, #tpu.memory_space<vmem>>, vector<1x32xf32>
    %306 = vector.broadcast %305 : vector<1x32xf32> to vector<16x32xf32>
    %307 = arith.addf %304, %306 : vector<16x32xf32>
    %308 = arith.addf %194, %307 : vector<16x32xf32>
    %c16 = arith.constant 16 : index
    %c0_115 = arith.constant 0 : index
    %309 = vector.load %arg12[%c16, %c0_115] : memref<23x32xf32, #tpu.memory_space<vmem>>, vector<1x32xf32>
    %c17 = arith.constant 17 : index
    %c0_116 = arith.constant 0 : index
    %310 = vector.load %arg12[%c17, %c0_116] : memref<23x32xf32, #tpu.memory_space<vmem>>, vector<1x32xf32>
    %cst_117 = arith.constant dense<0.000000e+00> : vector<16xf32>
    %311 = vector.multi_reduction <add>, %308, %cst_117 [1] : vector<16x32xf32> to vector<16xf32>
    %312 = vector.shape_cast %311 : vector<16xf32> to vector<16x1xf32>
    %cst_118 = arith.constant 3.200000e+01 : f32
    %313 = vector.broadcast %cst_118 : f32 to vector<16x1xf32>
    %314 = arith.divf %312, %313 : vector<16x1xf32>
    %315 = vector.broadcast %314 : vector<16x1xf32> to vector<16x32xf32>
    %316 = arith.subf %308, %315 : vector<16x32xf32>
    %317 = arith.mulf %316, %316 : vector<16x32xf32>
    %cst_119 = arith.constant dense<0.000000e+00> : vector<16xf32>
    %318 = vector.multi_reduction <add>, %317, %cst_119 [1] : vector<16x32xf32> to vector<16xf32>
    %319 = vector.shape_cast %318 : vector<16xf32> to vector<16x1xf32>
    %cst_120 = arith.constant 3.200000e+01 : f32
    %320 = vector.broadcast %cst_120 : f32 to vector<16x1xf32>
    %321 = arith.divf %319, %320 : vector<16x1xf32>
    %cst_121 = arith.constant 9.99999974E-6 : f32
    %322 = vector.broadcast %cst_121 : f32 to vector<16x1xf32>
    %323 = arith.addf %321, %322 : vector<16x1xf32>
    %324 = math.rsqrt %323 : vector<16x1xf32>
    %325 = vector.broadcast %324 : vector<16x1xf32> to vector<16x32xf32>
    %326 = arith.mulf %316, %325 : vector<16x32xf32>
    %327 = vector.broadcast %309 : vector<1x32xf32> to vector<16x32xf32>
    %328 = arith.mulf %326, %327 : vector<16x32xf32>
    %329 = vector.broadcast %310 : vector<1x32xf32> to vector<16x32xf32>
    %330 = arith.addf %328, %329 : vector<16x32xf32>
    %331 = arith.truncf %330 : vector<16x32xf32> to vector<16x32xbf16>
    %c1_122 = arith.constant 1 : index
    %c0_123 = arith.constant 0 : index
    %c0_124 = arith.constant 0 : index
    %332 = vector.load %arg6[%c1_122, %c0_123, %c0_124] : memref<2x32x64xbf16, #tpu.memory_space<vmem>>, vector<1x32x64xbf16>
    %333 = vector.shape_cast %332 : vector<1x32x64xbf16> to vector<32x64xbf16>
    %cst_125 = arith.constant dense<0.000000e+00> : vector<16x64xf32>
    %334 = tpu.matmul %331, %333, %cst_125 {dimension_numbers = #tpu.dot_dimension_numbers<[1], [0], [0], [1], [0, 0, 1, 1], [], []>} : vector<16x32xbf16>, vector<32x64xbf16>, vector<16x64xf32> -> vector<16x64xf32>
    %c1_126 = arith.constant 1 : index
    %c0_127 = arith.constant 0 : index
    %c0_128 = arith.constant 0 : index
    %335 = vector.load %arg11[%c1_126, %c0_127, %c0_128] : memref<2x1x64xf32, #tpu.memory_space<vmem>>, vector<1x1x64xf32>
    %336 = vector.shape_cast %335 : vector<1x1x64xf32> to vector<1x64xf32>
    %337 = vector.broadcast %336 : vector<1x64xf32> to vector<16x64xf32>
    %338 = arith.addf %334, %337 : vector<16x64xf32>
    %cst_129 = arith.constant 0.000000e+00 : f32
    %339 = vector.broadcast %cst_129 : f32 to vector<16x64xf32>
    %340 = arith.maximumf %338, %339 : vector<16x64xf32>
    %341 = arith.truncf %340 : vector<16x64xf32> to vector<16x64xbf16>
    %c1_130 = arith.constant 1 : index
    %c0_131 = arith.constant 0 : index
    %c0_132 = arith.constant 0 : index
    %342 = vector.load %arg7[%c1_130, %c0_131, %c0_132] : memref<2x64x32xbf16, #tpu.memory_space<vmem>>, vector<1x64x32xbf16>
    %343 = vector.shape_cast %342 : vector<1x64x32xbf16> to vector<64x32xbf16>
    %cst_133 = arith.constant dense<0.000000e+00> : vector<16x32xf32>
    %344 = tpu.matmul %341, %343, %cst_133 {dimension_numbers = #tpu.dot_dimension_numbers<[1], [0], [0], [1], [0, 0, 1, 1], [], []>} : vector<16x64xbf16>, vector<64x32xbf16>, vector<16x32xf32> -> vector<16x32xf32>
    %c14 = arith.constant 14 : index
    %c0_134 = arith.constant 0 : index
    %345 = vector.load %arg12[%c14, %c0_134] : memref<23x32xf32, #tpu.memory_space<vmem>>, vector<1x32xf32>
    %346 = vector.broadcast %345 : vector<1x32xf32> to vector<16x32xf32>
    %347 = arith.addf %344, %346 : vector<16x32xf32>
    %348 = arith.truncf %347 : vector<16x32xf32> to vector<16x32xbf16>
    %c1_135 = arith.constant 1 : index
    %c0_136 = arith.constant 0 : index
    %c0_137 = arith.constant 0 : index
    %349 = vector.load %arg8[%c1_135, %c0_136, %c0_137] : memref<2x32x32xbf16, #tpu.memory_space<vmem>>, vector<1x32x32xbf16>
    %350 = vector.shape_cast %349 : vector<1x32x32xbf16> to vector<32x32xbf16>
    %cst_138 = arith.constant dense<0.000000e+00> : vector<16x32xf32>
    %351 = tpu.matmul %348, %350, %cst_138 {dimension_numbers = #tpu.dot_dimension_numbers<[1], [0], [0], [1], [0, 0, 1, 1], [], []>} : vector<16x32xbf16>, vector<32x32xbf16>, vector<16x32xf32> -> vector<16x32xf32>
    %352 = vector.extract_strided_slice %9 {offsets = [0, 32], sizes = [16, 32], strides = [1, 1]} : vector<16x64xf32> to vector<16x32xf32>
    %353 = arith.addf %351, %352 : vector<16x32xf32>
    %c15 = arith.constant 15 : index
    %c0_139 = arith.constant 0 : index
    %354 = vector.load %arg12[%c15, %c0_139] : memref<23x32xf32, #tpu.memory_space<vmem>>, vector<1x32xf32>
    %355 = vector.broadcast %354 : vector<1x32xf32> to vector<16x32xf32>
    %356 = arith.addf %353, %355 : vector<16x32xf32>
    %357 = arith.addf %330, %356 : vector<16x32xf32>
    %c18 = arith.constant 18 : index
    %c0_140 = arith.constant 0 : index
    %358 = vector.load %arg12[%c18, %c0_140] : memref<23x32xf32, #tpu.memory_space<vmem>>, vector<1x32xf32>
    %c19 = arith.constant 19 : index
    %c0_141 = arith.constant 0 : index
    %359 = vector.load %arg12[%c19, %c0_141] : memref<23x32xf32, #tpu.memory_space<vmem>>, vector<1x32xf32>
    %cst_142 = arith.constant dense<0.000000e+00> : vector<16xf32>
    %360 = vector.multi_reduction <add>, %357, %cst_142 [1] : vector<16x32xf32> to vector<16xf32>
    %361 = vector.shape_cast %360 : vector<16xf32> to vector<16x1xf32>
    %cst_143 = arith.constant 3.200000e+01 : f32
    %362 = vector.broadcast %cst_143 : f32 to vector<16x1xf32>
    %363 = arith.divf %361, %362 : vector<16x1xf32>
    %364 = vector.broadcast %363 : vector<16x1xf32> to vector<16x32xf32>
    %365 = arith.subf %357, %364 : vector<16x32xf32>
    %366 = arith.mulf %365, %365 : vector<16x32xf32>
    %cst_144 = arith.constant dense<0.000000e+00> : vector<16xf32>
    %367 = vector.multi_reduction <add>, %366, %cst_144 [1] : vector<16x32xf32> to vector<16xf32>
    %368 = vector.shape_cast %367 : vector<16xf32> to vector<16x1xf32>
    %cst_145 = arith.constant 3.200000e+01 : f32
    %369 = vector.broadcast %cst_145 : f32 to vector<16x1xf32>
    %370 = arith.divf %368, %369 : vector<16x1xf32>
    %cst_146 = arith.constant 9.99999974E-6 : f32
    %371 = vector.broadcast %cst_146 : f32 to vector<16x1xf32>
    %372 = arith.addf %370, %371 : vector<16x1xf32>
    %373 = math.rsqrt %372 : vector<16x1xf32>
    %374 = vector.broadcast %373 : vector<16x1xf32> to vector<16x32xf32>
    %375 = arith.mulf %365, %374 : vector<16x32xf32>
    %376 = vector.broadcast %358 : vector<1x32xf32> to vector<16x32xf32>
    %377 = arith.mulf %375, %376 : vector<16x32xf32>
    %378 = vector.broadcast %359 : vector<1x32xf32> to vector<16x32xf32>
    %379 = arith.addf %377, %378 : vector<16x32xf32>
    %c20 = arith.constant 20 : index
    %c0_147 = arith.constant 0 : index
    %380 = vector.load %arg12[%c20, %c0_147] : memref<23x32xf32, #tpu.memory_space<vmem>>, vector<1x32xf32>
    %c21 = arith.constant 21 : index
    %c0_148 = arith.constant 0 : index
    %381 = vector.load %arg12[%c21, %c0_148] : memref<23x32xf32, #tpu.memory_space<vmem>>, vector<1x32xf32>
    %cst_149 = arith.constant dense<0.000000e+00> : vector<16xf32>
    %382 = vector.multi_reduction <add>, %379, %cst_149 [1] : vector<16x32xf32> to vector<16xf32>
    %383 = vector.shape_cast %382 : vector<16xf32> to vector<16x1xf32>
    %cst_150 = arith.constant 3.200000e+01 : f32
    %384 = vector.broadcast %cst_150 : f32 to vector<16x1xf32>
    %385 = arith.divf %383, %384 : vector<16x1xf32>
    %386 = vector.broadcast %385 : vector<16x1xf32> to vector<16x32xf32>
    %387 = arith.subf %379, %386 : vector<16x32xf32>
    %388 = arith.mulf %387, %387 : vector<16x32xf32>
    %cst_151 = arith.constant dense<0.000000e+00> : vector<16xf32>
    %389 = vector.multi_reduction <add>, %388, %cst_151 [1] : vector<16x32xf32> to vector<16xf32>
    %390 = vector.shape_cast %389 : vector<16xf32> to vector<16x1xf32>
    %cst_152 = arith.constant 3.200000e+01 : f32
    %391 = vector.broadcast %cst_152 : f32 to vector<16x1xf32>
    %392 = arith.divf %390, %391 : vector<16x1xf32>
    %cst_153 = arith.constant 9.99999974E-6 : f32
    %393 = vector.broadcast %cst_153 : f32 to vector<16x1xf32>
    %394 = arith.addf %392, %393 : vector<16x1xf32>
    %395 = math.rsqrt %394 : vector<16x1xf32>
    %396 = vector.broadcast %395 : vector<16x1xf32> to vector<16x32xf32>
    %397 = arith.mulf %387, %396 : vector<16x32xf32>
    %398 = vector.broadcast %380 : vector<1x32xf32> to vector<16x32xf32>
    %399 = arith.mulf %397, %398 : vector<16x32xf32>
    %400 = vector.broadcast %381 : vector<1x32xf32> to vector<16x32xf32>
    %401 = arith.addf %399, %400 : vector<16x32xf32>
    %cst_154 = arith.constant 5.000000e-01 : f32
    %402 = vector.broadcast %cst_154 : f32 to vector<16x32xf32>
    %403 = arith.mulf %402, %401 : vector<16x32xf32>
    %cst_155 = arith.constant 4.471500e-02 : f32
    %404 = vector.broadcast %cst_155 : f32 to vector<16x32xf32>
    %405 = arith.mulf %404, %401 : vector<16x32xf32>
    %406 = arith.mulf %405, %401 : vector<16x32xf32>
    %407 = arith.mulf %406, %401 : vector<16x32xf32>
    %408 = arith.addf %401, %407 : vector<16x32xf32>
    %cst_156 = arith.constant 0.797884583 : f32
    %409 = vector.broadcast %cst_156 : f32 to vector<16x32xf32>
    %410 = arith.mulf %409, %408 : vector<16x32xf32>
    %411 = math.tanh %410 : vector<16x32xf32>
    %cst_157 = arith.constant 1.000000e+00 : f32
    %412 = vector.broadcast %cst_157 : f32 to vector<16x32xf32>
    %413 = arith.addf %412, %411 : vector<16x32xf32>
    %414 = arith.mulf %403, %413 : vector<16x32xf32>
    %415 = vector.shape_cast %414 : vector<16x32xf32> to vector<2x8x32xf32>
    %cst_158 = arith.constant 0.000000e+00 : f32
    %416 = vector.broadcast %cst_158 : f32 to vector<2x8xf32>
    %417 = vector.extract_strided_slice %415 {offsets = [0, 0, 0], sizes = [2, 1, 32], strides = [1, 1, 1]} : vector<2x8x32xf32> to vector<2x1x32xf32>
    %418 = vector.shape_cast %417 : vector<2x1x32xf32> to vector<2x32xf32>
    %419 = arith.truncf %418 : vector<2x32xf32> to vector<2x32xbf16>
    %c0_159 = arith.constant 0 : index
    %c0_160 = arith.constant 0 : index
    %c0_161 = arith.constant 0 : index
    %420 = vector.load %arg10[%c0_159, %c0_160, %c0_161] : memref<8x32x8xbf16, #tpu.memory_space<vmem>>, vector<1x32x8xbf16>
    %421 = vector.shape_cast %420 : vector<1x32x8xbf16> to vector<32x8xbf16>
    %cst_162 = arith.constant dense<0.000000e+00> : vector<2x8xf32>
    %422 = tpu.matmul %419, %421, %cst_162 {dimension_numbers = #tpu.dot_dimension_numbers<[1], [0], [0], [1], [0, 0, 1, 1], [], []>} : vector<2x32xbf16>, vector<32x8xbf16>, vector<2x8xf32> -> vector<2x8xf32>
    %423 = arith.addf %416, %422 : vector<2x8xf32>
    %424 = vector.extract_strided_slice %415 {offsets = [0, 1, 0], sizes = [2, 1, 32], strides = [1, 1, 1]} : vector<2x8x32xf32> to vector<2x1x32xf32>
    %425 = vector.shape_cast %424 : vector<2x1x32xf32> to vector<2x32xf32>
    %426 = arith.truncf %425 : vector<2x32xf32> to vector<2x32xbf16>
    %c1_163 = arith.constant 1 : index
    %c0_164 = arith.constant 0 : index
    %c0_165 = arith.constant 0 : index
    %427 = vector.load %arg10[%c1_163, %c0_164, %c0_165] : memref<8x32x8xbf16, #tpu.memory_space<vmem>>, vector<1x32x8xbf16>
    %428 = vector.shape_cast %427 : vector<1x32x8xbf16> to vector<32x8xbf16>
    %cst_166 = arith.constant dense<0.000000e+00> : vector<2x8xf32>
    %429 = tpu.matmul %426, %428, %cst_166 {dimension_numbers = #tpu.dot_dimension_numbers<[1], [0], [0], [1], [0, 0, 1, 1], [], []>} : vector<2x32xbf16>, vector<32x8xbf16>, vector<2x8xf32> -> vector<2x8xf32>
    %430 = arith.addf %423, %429 : vector<2x8xf32>
    %431 = vector.extract_strided_slice %415 {offsets = [0, 2, 0], sizes = [2, 1, 32], strides = [1, 1, 1]} : vector<2x8x32xf32> to vector<2x1x32xf32>
    %432 = vector.shape_cast %431 : vector<2x1x32xf32> to vector<2x32xf32>
    %433 = arith.truncf %432 : vector<2x32xf32> to vector<2x32xbf16>
    %c2_167 = arith.constant 2 : index
    %c0_168 = arith.constant 0 : index
    %c0_169 = arith.constant 0 : index
    %434 = vector.load %arg10[%c2_167, %c0_168, %c0_169] : memref<8x32x8xbf16, #tpu.memory_space<vmem>>, vector<1x32x8xbf16>
    %435 = vector.shape_cast %434 : vector<1x32x8xbf16> to vector<32x8xbf16>
    %cst_170 = arith.constant dense<0.000000e+00> : vector<2x8xf32>
    %436 = tpu.matmul %433, %435, %cst_170 {dimension_numbers = #tpu.dot_dimension_numbers<[1], [0], [0], [1], [0, 0, 1, 1], [], []>} : vector<2x32xbf16>, vector<32x8xbf16>, vector<2x8xf32> -> vector<2x8xf32>
    %437 = arith.addf %430, %436 : vector<2x8xf32>
    %438 = vector.extract_strided_slice %415 {offsets = [0, 3, 0], sizes = [2, 1, 32], strides = [1, 1, 1]} : vector<2x8x32xf32> to vector<2x1x32xf32>
    %439 = vector.shape_cast %438 : vector<2x1x32xf32> to vector<2x32xf32>
    %440 = arith.truncf %439 : vector<2x32xf32> to vector<2x32xbf16>
    %c3_171 = arith.constant 3 : index
    %c0_172 = arith.constant 0 : index
    %c0_173 = arith.constant 0 : index
    %441 = vector.load %arg10[%c3_171, %c0_172, %c0_173] : memref<8x32x8xbf16, #tpu.memory_space<vmem>>, vector<1x32x8xbf16>
    %442 = vector.shape_cast %441 : vector<1x32x8xbf16> to vector<32x8xbf16>
    %cst_174 = arith.constant dense<0.000000e+00> : vector<2x8xf32>
    %443 = tpu.matmul %440, %442, %cst_174 {dimension_numbers = #tpu.dot_dimension_numbers<[1], [0], [0], [1], [0, 0, 1, 1], [], []>} : vector<2x32xbf16>, vector<32x8xbf16>, vector<2x8xf32> -> vector<2x8xf32>
    %444 = arith.addf %437, %443 : vector<2x8xf32>
    %445 = vector.extract_strided_slice %415 {offsets = [0, 4, 0], sizes = [2, 1, 32], strides = [1, 1, 1]} : vector<2x8x32xf32> to vector<2x1x32xf32>
    %446 = vector.shape_cast %445 : vector<2x1x32xf32> to vector<2x32xf32>
    %447 = arith.truncf %446 : vector<2x32xf32> to vector<2x32xbf16>
    %c4_175 = arith.constant 4 : index
    %c0_176 = arith.constant 0 : index
    %c0_177 = arith.constant 0 : index
    %448 = vector.load %arg10[%c4_175, %c0_176, %c0_177] : memref<8x32x8xbf16, #tpu.memory_space<vmem>>, vector<1x32x8xbf16>
    %449 = vector.shape_cast %448 : vector<1x32x8xbf16> to vector<32x8xbf16>
    %cst_178 = arith.constant dense<0.000000e+00> : vector<2x8xf32>
    %450 = tpu.matmul %447, %449, %cst_178 {dimension_numbers = #tpu.dot_dimension_numbers<[1], [0], [0], [1], [0, 0, 1, 1], [], []>} : vector<2x32xbf16>, vector<32x8xbf16>, vector<2x8xf32> -> vector<2x8xf32>
    %451 = arith.addf %444, %450 : vector<2x8xf32>
    %452 = vector.extract_strided_slice %415 {offsets = [0, 5, 0], sizes = [2, 1, 32], strides = [1, 1, 1]} : vector<2x8x32xf32> to vector<2x1x32xf32>
    %453 = vector.shape_cast %452 : vector<2x1x32xf32> to vector<2x32xf32>
    %454 = arith.truncf %453 : vector<2x32xf32> to vector<2x32xbf16>
    %c5_179 = arith.constant 5 : index
    %c0_180 = arith.constant 0 : index
    %c0_181 = arith.constant 0 : index
    %455 = vector.load %arg10[%c5_179, %c0_180, %c0_181] : memref<8x32x8xbf16, #tpu.memory_space<vmem>>, vector<1x32x8xbf16>
    %456 = vector.shape_cast %455 : vector<1x32x8xbf16> to vector<32x8xbf16>
    %cst_182 = arith.constant dense<0.000000e+00> : vector<2x8xf32>
    %457 = tpu.matmul %454, %456, %cst_182 {dimension_numbers = #tpu.dot_dimension_numbers<[1], [0], [0], [1], [0, 0, 1, 1], [], []>} : vector<2x32xbf16>, vector<32x8xbf16>, vector<2x8xf32> -> vector<2x8xf32>
    %458 = arith.addf %451, %457 : vector<2x8xf32>
    %459 = vector.extract_strided_slice %415 {offsets = [0, 6, 0], sizes = [2, 1, 32], strides = [1, 1, 1]} : vector<2x8x32xf32> to vector<2x1x32xf32>
    %460 = vector.shape_cast %459 : vector<2x1x32xf32> to vector<2x32xf32>
    %461 = arith.truncf %460 : vector<2x32xf32> to vector<2x32xbf16>
    %c6_183 = arith.constant 6 : index
    %c0_184 = arith.constant 0 : index
    %c0_185 = arith.constant 0 : index
    %462 = vector.load %arg10[%c6_183, %c0_184, %c0_185] : memref<8x32x8xbf16, #tpu.memory_space<vmem>>, vector<1x32x8xbf16>
    %463 = vector.shape_cast %462 : vector<1x32x8xbf16> to vector<32x8xbf16>
    %cst_186 = arith.constant dense<0.000000e+00> : vector<2x8xf32>
    %464 = tpu.matmul %461, %463, %cst_186 {dimension_numbers = #tpu.dot_dimension_numbers<[1], [0], [0], [1], [0, 0, 1, 1], [], []>} : vector<2x32xbf16>, vector<32x8xbf16>, vector<2x8xf32> -> vector<2x8xf32>
    %465 = arith.addf %458, %464 : vector<2x8xf32>
    %466 = vector.extract_strided_slice %415 {offsets = [0, 7, 0], sizes = [2, 1, 32], strides = [1, 1, 1]} : vector<2x8x32xf32> to vector<2x1x32xf32>
    %467 = vector.shape_cast %466 : vector<2x1x32xf32> to vector<2x32xf32>
    %468 = arith.truncf %467 : vector<2x32xf32> to vector<2x32xbf16>
    %c7_187 = arith.constant 7 : index
    %c0_188 = arith.constant 0 : index
    %c0_189 = arith.constant 0 : index
    %469 = vector.load %arg10[%c7_187, %c0_188, %c0_189] : memref<8x32x8xbf16, #tpu.memory_space<vmem>>, vector<1x32x8xbf16>
    %470 = vector.shape_cast %469 : vector<1x32x8xbf16> to vector<32x8xbf16>
    %cst_190 = arith.constant dense<0.000000e+00> : vector<2x8xf32>
    %471 = tpu.matmul %468, %470, %cst_190 {dimension_numbers = #tpu.dot_dimension_numbers<[1], [0], [0], [1], [0, 0, 1, 1], [], []>} : vector<2x32xbf16>, vector<32x8xbf16>, vector<2x8xf32> -> vector<2x8xf32>
    %472 = arith.addf %465, %471 : vector<2x8xf32>
    %c22 = arith.constant 22 : index
    %c0_191 = arith.constant 0 : index
    %473 = vector.load %arg12[%c22, %c0_191] : memref<23x32xf32, #tpu.memory_space<vmem>>, vector<1x8xf32>
    %474 = vector.broadcast %473 : vector<1x8xf32> to vector<2x8xf32>
    %475 = arith.addf %472, %474 : vector<2x8xf32>
    %c0_192 = arith.constant 0 : index
    %c0_193 = arith.constant 0 : index
    %476 = vector.load %arg13[%c0_192, %c0_193] : memref<2x8xf32, #tpu.memory_space<vmem>>, vector<2x8xf32>
    tpu.vector_store %arg13[%c0_192, %c0_193], %475 {strides = array<i32>} : memref<2x8xf32, #tpu.memory_space<vmem>>, vector<2x8xf32>,
    return
  }
}

</mosaic_0001>

<bundles_post_ra>
// kernel: model_forward.1
= control target key start
LH: loop header
LB: loop body
LE: loop exit
PB: predicated region body
PF: predicated region fallthrough
CT: control target
= control target key end

     0   :  { %vm62_vm0 = vcmask 1045504   ;;  %vm58_vm1 = vcmask 97280   ;;  %s3514_s0 = inlined_call_operand.vmem [shape: f32[16,12], index: 0, kind: input, shape index: {}]   ;;  %s3515_s1 = inlined_call_operand.vmem [shape: f32[16,40], index: 1, kind: input, shape index: {}]   ;;  %s3516_s2 = inlined_call_operand.vmem [shape: f32[16,32], index: 2, kind: input, shape index: {}]   ;;  %s3517_s3 = inlined_call_operand.vmem [shape: bf16[12,32], index: 3, kind: input, shape index: {}]   ;;  %s3518_s4 = inlined_call_operand.vmem [shape: bf16[2,32,96], index: 4, kind: input, shape index: {}]   ;;  %s3519_s5 = inlined_call_operand.vmem [shape: bf16[2,32,32], index: 5, kind: input, shape index: {}]   ;;  %s3520_s6 = inlined_call_operand.vmem [shape: bf16[2,32,64], index: 6, kind: input, shape index: {}]   ;;  %s3521_s7 = inlined_call_operand.vmem [shape: bf16[2,64,32], index: 7, kind: input, shape index: {}]   ;;  %s3522_s8 = inlined_call_operand.vmem [shape: bf16[2,32,32], index: 8, kind: input, shape index: {}]   ;;  %s3523_s9 = inlined_call_operand.vmem [shape: bf16[40,64], index: 9, kind: input, shape index: {}]   ;;  %s3524_s10 = inlined_call_operand.vmem [shape: bf16[8,32,8], index: 10, kind: input, shape index: {}]   ;;  %s3525_s11 = inlined_call_operand.vmem [shape: f32[2,1,64], index: 11, kind: input, shape index: {}]   ;;  %s3526_s12 = inlined_call_operand.vmem [shape: f32[23,32], index: 12, kind: input, shape index: {}]   ;;  %s3527_s13 = inlined_call_operand.hbm [shape: f32[2,8], index: 13, kind: output, shape index: {}]  }
   0x1   :  { %v2384_v0 = vld [vmem:[%s3517_s3] sm:$0xf]  ;;  %v2665_v1 = vld [vmem:[%s3517_s3] sm:$0x30]  ;;  %v47_v4 = vld [vmem:[%s3514_s0 + $0x8] sm:$0xff] }
   0x2   :  { %v46_v2 = vld [vmem:[%s3514_s0] sm:$0xff]  ;;  %v2385_v3 = vor.u32 %v2665_v1, %v2384_v0 }
   0x3   :  { %v48_v6 = vpack.c.bf16 %v47_v4, %v46_v2 }
   0x4   :  { %v64_v5 = vsel %vm62_vm0, %v2385_v3, 0 }
   0x5   :  { %73 = vmatpush.bf16.msra.mxu0 %v64_v5 }
   0x8   :  { %2386 = vmatmul.msk.bf16.vlgmr.msra.gmra.mxu0 %vm58_vm1, %v48_v6 }
   0x9   :  { %18 = vsyncpa [#allocation3], 0  ;;  %v2669_v7 = vld [vmem:[%s3518_s4 + $0x8] sm:$0xff]  ;;  %v2668_v8 = vld [vmem:[%s3518_s4] sm:$0xff]  ;;  %s2859_s0 = smov 32   ;;  %vm142_vm2 = vcmask 261120  }
   0xa   :  { %152 = vmatpush.bf16.msra.mxu2 %v2669_v7  ;;  %v2718_v9 = vld [vmem:[%s3526_s12 + $0x1] ss:$0 sm:$0xff]  ;;  %v52_v12 = vld [vmem:[%s3516_s2 + $0x8] sm:$0xff]  ;;  %s2860_s25 = smov 88   ;;  %v2719_v20 = vld [vmem:[%s3526_s12] ss:$0 sm:$0xff] }
   0xb   :  { %167 = vrot.lane.b32.xlu0 %v2718_v9, %s2859_s0  ;;  %v51_v11 = vld [vmem:[%s3516_s2] sm:$0xff]  ;;  %s2861_s2 = smov 96   ;;  %s2862_s28 = smov 120   ;;  %vm187_vm3 = vcmask 64512   ;;  %v87_v32 = vld [vmem:[%s3523_s9 + $0x10] sm:$0xf] }
   0xc   :  { %v2720_v24 = vld [vmem:[%s3526_s12 + $0x2] ss:$0 sm:$0xff]  ;;  %s2863_s14 = smov 64   ;;  %s2864_s15 = smov 56   ;;  %v97_v33 = vunpack.c.l.b16 %v87_v32  ;;  %vm107_vm4 = vcmask 1043456   ;;  %v2667_v36 = vld [vmem:[%s3523_s9 + $0x8] sm:$0xff] }
   0xd   :  { %s2865_s16 = smov 80   ;;  %s2866_s17 = smov 112   ;;  %v2666_v37 = vld [vmem:[%s3523_s9] sm:$0xff]  ;;  %v81_v39 = vld [vmem:[%s3515_s1 + $0x8] sm:$0xff]  ;;  %vm103_vm5 = vcmask 326656   ;;  %vm943_vm13 = vcmask 523264  }
   0xe   :  { %153 = vmatpush.bf16.msra.mxu2 %v2668_v8  ;;  %v100_v34 = vpack.c.b16 %v97_v33, %v97_v33  ;;  %v80_v38 = vld [vmem:[%s3515_s1] sm:$0xff]  ;;  %s2867_s1 = smov 72   ;;  %s2868_s9 = smov 104  }
   0xf   :  { %v82_v40 = vpack.c.bf16 %v81_v39, %v80_v38  ;;  %v180_v62 = vld [vmem:[%s3519_s5] sm:$0xf]  ;;  %s2869_s3 = smov 48   ;;  %s2870_s18 = smov 40  }
  0x10   :  { %v109_v35 = vsel %vm107_vm4, %v100_v34, 0  ;;  %v477_v2 = vsel %vm107_vm4, %v180_v62, 0  ;;  %s2872_s21 = smov [#allocation2]  }
  0x11   :  { %116 = vmatpush.bf16.msra.mxu1 %v109_v35  ;;  %s2371_s22 = sshll.u32 %s2872_s21, 4  ;;  %s2372_s22 = int_to_ptr.vmem [resolvable:$true] %s2371_s22 }
  0x15   :  { %117 = vmatpush.bf16.msra.mxu1 %v2667_v36 }
  0x19   :  { %118 = vmatpush.bf16.msra.mxu1 %v2666_v37 }
  0x1c   :  { %2395 = vmatmul.msk.bf16.vlgmr.msra.gmra.mxu1 %vm103_vm5, %v82_v40 }
  0x7d   :  { %v168_v17 = vpop.permute.xlu0 %167 }
  0x85   :  { %v75_v10 = vpop.f32.mrf.mxu0 }
  0x86   :  { %v2971_v14 = vadd.f32 %v75_v10, %v51_v11 }
  0x8d   :  { %v77_v13 = vpop.f32.mrf.mxu0 }
  0x8e   :  { %v2973_v15 = vadd.f32 %v77_v13, %v52_v12 }
  0x90   :  { %v125_v16 = vpack.c.bf16 %v2973_v15, %v2971_v14 }
  0x92   :  { %2404 = vmatmul.msk.bf16.vlgmr.msra.gmra.mxu2 %vm142_vm2, %v125_v16 }
  0x99   :  { %v3089_v32 = vpop.f32.mrf.mxu1 }
  0xa1   :  { %v3091_v33 = vpop.f32.mrf.mxu1 }
 0x115   :  { %v155_v18 = vpop.f32.mrf.mxu2 }
 0x116   :  { %v2978_v19 = vadd.f32 %v168_v17, %v155_v18  ;;  %v2989_v22 = vadd.f32 %v2719_v20, %v155_v18 }
 0x118   :  { %322 = vrot.lane.b32.xlu1 %v2978_v19, %s2860_s25  ;;  %185 = vrot.lane.b32.xlu0 %v2978_v19, %s2861_s2 }
 0x11d   :  { %v2987_v21 = vpop.f32.mrf.mxu2 }
 0x11e   :  { %v2992_v23 = vadd.f32 %v168_v17, %v2987_v21  ;;  %v3009_v30 = vadd.f32 %v2719_v20, %v2987_v21 }
 0x120   :  { %320 = vrot.lane.b32.xlu1 %v2989_v22, %s2862_s28  ;;  %214 = vrot.lane.b32.xlu2 %v2992_v23, %s2861_s2 }
 0x128   :  { %175 = vrot.lane.b32.xlu2 %v2720_v24, %s2863_s14 }
 0x130   :  { %350 = vrot.lane.b32.xlu2 %v2992_v23, %s2860_s25 }
 0x17a   :  { %v215_v25 = vpop.permute.xlu2 %214 }
 0x182   :  { %v176_v26 = vpop.permute.xlu2 %175 }
 0x183   :  { %v3004_v27 = vadd.f32 %v176_v26, %v155_v18  ;;  %v3049_v55 = vadd.f32 %v176_v26, %v2987_v21 }
 0x185   :  { %264 = vrot.lane.b32.xlu1 %v3004_v27, %s2863_s14 }
 0x18a   :  { %v323_v28 = vpop.permute.xlu1 %322  ;;  %v186_v29 = vpop.permute.xlu0 %185 }
 0x18b   :  { %2405 = vmatpush.xpose.msk.msra.mxu3 %vm187_vm3, %v186_v29  ;;  %2411 = vmatpush.xpose.msk.msrb.mxu2 %vm187_vm3, %v323_v28  ;;  %v351_v42 = vpop.permute.xlu2 %350 }
 0x18d   :  { %348 = vrot.lane.b32.xlu1 %v3009_v30, %s2862_s28 }
 0x18e   :  { %2406 = vmatmul.msk.f32.vlgmr.msra.gmra.mxu3 %vm187_vm3, %v2989_v22 }
 0x18f   :  { %2407 = vmatpush.xpose.msk.msrb.mxu3 %vm187_vm3, %v215_v25 }
 0x192   :  { %v321_v31 = vpop.permute.xlu1 %320 }
 0x193   :  { %2412 = vmatmul.msk.f32.vlgmr.msrb.gmra.mxu2 %vm187_vm3, %v321_v31 }
 0x195   :  { %398 = vrot.lane.b32.xlu1 %v3004_v27, %s2864_s15 }
 0x196   :  { %2408 = vmatmul.msk.f32.vlgmr.msrb.gmra.mxu3 %vm187_vm3, %v3009_v30 }
 0x19d   :  { %495 = vrot.lane.b32.xlu1 %v2978_v19, %s2865_s16 }
 0x1a5   :  { %493 = vrot.lane.b32.xlu1 %v2989_v22, %s2866_s17 }
 0x1f7   :  { %v265_v41 = vpop.permute.xlu1 %264 }
 0x1f8   :  { %285 = vmatpush.msrb.mxu0 %v265_v41 }
 0x1fa   :  { %2413 = vmatpush.xpose.msk.msra.mxu0 %vm187_vm3, %v351_v42 }
 0x1ff   :  { %v349_v43 = vpop.permute.xlu1 %348 }
 0x207   :  { %v399_v44 = vpop.permute.xlu1 %398 }
 0x208   :  { %419 = vmatpush.msrb.mxu1 %v399_v44 }
 0x20f   :  { %v496_v45 = vpop.permute.xlu1 %495 }
 0x210   :  { %2419 = vmatpush.xpose.msk.msra.mxu1 %vm187_vm3, %v496_v45 }
 0x211   :  { %v210_v46 = vpop.f32.mrf.mxu3 }
 0x212   :  { %v241_v47 = vmul.f32 0.35355338, %v210_v46 }
 0x214   :  { %v243_v48 = vsel %vm187_vm3, %v241_v47, -inf }
 0x215   :  { %244 = vmax.xlane.f32.xlu0 %v243_v48 }
 0x216   :  { %v345_v49 = vpop.f32.mrf.mxu2 }
 0x217   :  { %v376_v50 = vmul.f32 0.35355338, %v345_v49  ;;  %v494_v56 = vpop.permute.xlu1 %493 }
 0x219   :  { %v238_v51 = vpop.f32.mrf.mxu3  ;;  %v378_v52 = vsel %vm187_vm3, %v376_v50, -inf }
 0x21a   :  { %v242_v53 = vmul.f32 0.35355338, %v238_v51  ;;  %379 = vmax.xlane.f32.xlu2 %v378_v52 }
 0x21c   :  { %v246_v54 = vsel %vm187_vm3, %v242_v53, -inf }
 0x21d   :  { %247 = vmax.xlane.f32.xlu1 %v246_v54 }
 0x229   :  { %291 = vrot.lane.b32.xlu0 %v3049_v55, %s2863_s14 }
 0x232   :  { %424 = vrot.lane.b32.xlu2 %v3049_v55, %s2864_s15 }
 0x236   :  { %523 = vrot.lane.b32.xlu1 %v2992_v23, %s2865_s16 }
 0x23e   :  { %650 = vrot.lane.b32.xlu1 %v2978_v19, %s2867_s1 }
 0x246   :  { %648 = vrot.lane.b32.xlu1 %v2989_v22, %s2868_s9 }
 0x24e   :  { %678 = vrot.lane.b32.xlu1 %v2992_v23, %s2867_s1 }
 0x288   :  { %v245_v57 = vpop.xlane.xlu0 %244 }
 0x289   :  { %v249_v58 = vsub.f32 %v241_v47, %v245_v57 }
 0x28b   :  { %v251_v59 = vmul.f32 1.442695, %v249_v58 }
 0x28d   :  { %2743 = vpow2.f32 %v251_v59  ;;  %v380_v60 = vpop.xlane.xlu2 %379 }
 0x28e   :  { %v384_v61 = vsub.f32 %v376_v50, %v380_v60 }
 0x290   :  { %v386_v63 = vmul.f32 1.442695, %v384_v61  ;;  %v248_v0 = vpop.xlane.xlu1 %247 }
 0x291   :  { %v250_v1 = vsub.f32 %v242_v53, %v248_v0 }
 0x292   :  { %2745 = vpow2.f32 %v386_v63 }
 0x293   :  { %v2744_v3 = vpop.eup %2743  ;;  %v253_v4 = vmul.f32 1.442695, %v250_v1 }
 0x294   :  { %2409 = vmatmul.msk.f32.vlgmr.msrb.gmra.mxu0 %vm187_vm3, %v2744_v3  ;;  %v255_v5 = vsel %vm187_vm3, %v2744_v3, 0.0 }
 0x295   :  { %2747 = vpow2.f32 %v253_v4  ;;  %256 = vadd.xlane.f32.xlu2 %v255_v5  ;;  %486 = vmatpush.bf16.msrb.mxu0 %v477_v2  ;;  %v425_v10 = vpop.permute.xlu2 %424 }
 0x298   :  { %v3069_v6 = vpop.eup %2745 }
 0x299   :  { %2415 = vmatmul.msk.f32.vlgmr.msrb.gmra.mxu1 %vm187_vm3, %v3069_v6  ;;  %v390_v53 = vsel %vm187_vm3, %v3069_v6, 0.0 }
 0x29b   :  { %v2748_v7 = vpop.eup %2747  ;;  %v292_v8 = vpop.permute.xlu0 %291 }
 0x29c   :  { %312 = vmatpush.msra.mxu3 %v292_v8  ;;  %2414 = vmatmul.msk.f32.vlgmr.msra.gmra.mxu0 %vm187_vm3, %v349_v43  ;;  %v258_v9 = vsel %vm187_vm3, %v2748_v7, 0.0 }
 0x29d   :  { %2410 = vmatmul.msk.f32.vlgmr.msra.gmra.mxu3 %vm187_vm3, %v2748_v7  ;;  %259 = vadd.xlane.f32.xlu0 %v258_v9 }
 0x29e   :  { %445 = vmatpush.msrb.mxu3 %v425_v10 }
 0x2a1   :  { %2420 = vmatmul.msk.f32.vlgmr.msra.gmra.mxu1 %vm187_vm3, %v494_v56 }
 0x2a8   :  { %v524_v11 = vpop.permute.xlu1 %523 }
 0x2a9   :  { %2421 = vmatpush.xpose.msk.msra.mxu3 %vm187_vm3, %v524_v11  ;;  %v181_v11 = vld [vmem:[%s3519_s5 + $0x4] sm:$0xf] }
 0x2b0   :  { %v651_v12 = vpop.permute.xlu1 %650 }
 0x2b1   :  { %571 = vrot.lane.b32.xlu0 %v3004_v27, %s2869_s3  ;;  %2426 = vmatpush.xpose.msk.msra.mxu0 %vm187_vm3, %v651_v12  ;;  %v457_v12 = vsel %vm107_vm4, %v181_v11, 0 }
 0x2b2   :  { %466 = vmatpush.bf16.msra.mxu2 %v457_v12 }
 0x2b8   :  { %v649_v19 = vpop.permute.xlu1 %648 }
 0x2b9   :  { %676 = vrot.lane.b32.xlu0 %v3009_v30, %s2868_s9 }
 0x2c0   :  { %v679_v31 = vpop.permute.xlu1 %678 }
 0x308   :  { %v257_v16 = vpop.xlane.xlu2 %256 }
 0x309   :  { %2749 = vrcp.f32 %v257_v16 }
 0x30f   :  { %v2750_v22 = vpop.eup %2749 }
 0x310   :  { %v260_v17 = vpop.xlane.xlu0 %259 }
 0x311   :  { %v287_v13 = vpop.f32.mrf.mxu0  ;;  %2751 = vrcp.f32 %v260_v17 }
 0x312   :  { %v317_v25 = vmul.f32 %v2750_v22, %v287_v13 }
 0x316   :  { %v3093_v34 = vpop.f32.mrf.mxu1 }
 0x317   :  { %v2752_v23 = vpop.eup %2751 }
 0x319   :  { %v373_v18 = vpop.f32.mrf.mxu0 }
 0x31a   :  { %v377_v20 = vmul.f32 0.35355338, %v373_v18 }
 0x31c   :  { %v381_v21 = vsel %vm187_vm3, %v377_v20, -inf }
 0x31d   :  { %382 = vmax.xlane.f32.xlu2 %v381_v21 }
 0x31e   :  { %v518_v35 = vpop.f32.mrf.mxu1 }
 0x31f   :  { %v549_v36 = vmul.f32 0.35355338, %v518_v35 }
 0x320   :  { %v314_v24 = vpop.f32.mrf.mxu3 }
 0x321   :  { %v318_v26 = vmul.f32 %v2752_v23, %v314_v24  ;;  %v551_v37 = vsel %vm187_vm3, %v549_v36, -inf }
 0x323   :  { %v319_v28 = vpack.c.bf16 %v318_v26, %v317_v25  ;;  %v572_v29 = vpop.permute.xlu0 %571 }
 0x324   :  { %592 = vmatpush.msrb.mxu1 %v572_v29 }
 0x325   :  { %2418 = vmatmul.msk.bf16.vlgmr.msrb.gmra.mxu0 %vm187_vm3, %v319_v28  ;;  %v182_v28 = vld [vmem:[%s3519_s5 + $0x8] sm:$0xf] }
 0x326   :  { %2428 = vmatpush.xpose.msk.msra.mxu1 %vm187_vm3, %v679_v31  ;;  %v630_v29 = vsel %vm107_vm4, %v182_v28, 0 }
 0x327   :  { %639 = vmatpush.bf16.msrb.mxu2 %v630_v29 }
 0x32b   :  { %v677_v52 = vpop.permute.xlu0 %676 }
 0x335   :  { %521 = vrot.lane.b32.xlu2 %v3009_v30, %s2866_s17  ;;  %2427 = vmatmul.msk.f32.vlgmr.msra.gmra.mxu0 %vm187_vm3, %v649_v19 }
 0x35e   :  { %552 = vmax.xlane.f32.xlu2 %v551_v37 }
 0x376   :  { %597 = vrot.lane.b32.xlu2 %v3049_v55, %s2869_s3 }
 0x390   :  { %v383_v38 = vpop.xlane.xlu2 %382 }
 0x391   :  { %v385_v39 = vsub.f32 %v377_v20, %v383_v38 }
 0x393   :  { %v388_v40 = vmul.f32 1.442695, %v385_v39 }
 0x395   :  { %2753 = vpow2.f32 %v388_v40 }
 0x398   :  { %v522_v42 = vpop.permute.xlu2 %521 }
 0x39b   :  { %v2754_v30 = vpop.eup %2753 }
 0x39c   :  { %2416 = vmatmul.msk.f32.vlgmr.msrb.gmra.mxu3 %vm187_vm3, %v2754_v30  ;;  %v393_v2 = vsel %vm187_vm3, %v2754_v30, 0.0 }
 0x3a2   :  { %v3099_v41 = vpop.f32.mrf.mxu0 }
 0x3a4   :  { %2422 = vmatmul.msk.f32.vlgmr.msra.gmra.mxu3 %vm187_vm3, %v522_v42  ;;  %v183_v42 = vld [vmem:[%s3519_s5 + $0xc] sm:$0xf] }
 0x3aa   :  { %v3102_v43 = vpop.f32.mrf.mxu0 }
 0x3b2   :  { %v673_v44 = vpop.f32.mrf.mxu0 }
 0x3b3   :  { %v704_v45 = vmul.f32 0.35355338, %v673_v44  ;;  %v785_v44 = vsel %vm107_vm4, %v183_v42, 0 }
 0x3b5   :  { %v706_v46 = vsel %vm187_vm3, %v704_v45, -inf }
 0x3b6   :  { %707 = vmax.xlane.f32.xlu0 %v706_v46 }
 0x3ca   :  { %752 = vrot.lane.b32.xlu0 %v3049_v55, %s2870_s18 }
 0x3d1   :  { %v553_v47 = vpop.xlane.xlu2 %552 }
 0x3d2   :  { %v557_v48 = vsub.f32 %v549_v36, %v553_v47 }
 0x3d4   :  { %v559_v49 = vmul.f32 1.442695, %v557_v48 }
 0x3d6   :  { %2755 = vpow2.f32 %v559_v49 }
 0x3d9   :  { %v598_v50 = vpop.permute.xlu2 %597 }
 0x3da   :  { %618 = vmatpush.msrb.mxu3 %v598_v50 }
 0x3dc   :  { %v2756_v51 = vpop.eup %2755 }
 0x3dd   :  { %2423 = vmatmul.msk.f32.vlgmr.msrb.gmra.mxu1 %vm187_vm3, %v2756_v51  ;;  %v563_v3 = vsel %vm187_vm3, %v2756_v51, 0.0 }
 0x3de   :  { %794 = vmatpush.bf16.msrb.mxu1 %v785_v44 }
 0x3e5   :  { %2429 = vmatmul.msk.f32.vlgmr.msra.gmra.mxu1 %vm187_vm3, %v677_v52 }
 0x3f4   :  { %391 = vadd.xlane.f32.xlu0 %v390_v53 }
 0x41f   :  { %v447_v54 = vpop.f32.mrf.mxu3 }
 0x427   :  { %v546_v56 = vpop.f32.mrf.mxu3 }
 0x428   :  { %v550_v57 = vmul.f32 0.35355338, %v546_v56 }
 0x429   :  { %v708_v58 = vpop.xlane.xlu0 %707 }
 0x42a   :  { %v554_v55 = vsel %vm187_vm3, %v550_v57, -inf  ;;  %v712_v63 = vsub.f32 %v704_v45, %v708_v58  ;;  %v2721_v58 = vld [vmem:[%s3526_s12 + $0x3] ss:$0 sm:$0xff] }
 0x42b   :  { %555 = vmax.xlane.f32.xlu1 %v554_v55 }
 0x42c   :  { %v714_v1 = vmul.f32 1.442695, %v712_v63 }
 0x42e   :  { %2757 = vpow2.f32 %v714_v1 }
 0x434   :  { %v2758_v4 = vpop.eup %2757 }
 0x435   :  { %v718_v5 = vsel %vm187_vm3, %v2758_v4, 0.0 }
 0x43c   :  { %v753_v59 = vpop.permute.xlu0 %752 }
 0x43d   :  { %773 = vmatpush.msrb.mxu0 %v753_v59 }
 0x444   :  { %726 = vrot.lane.b32.xlu1 %v3004_v27, %s2870_s18 }
 0x45a   :  { %v594_v60 = vpop.f32.mrf.mxu1 }
 0x462   :  { %v701_v61 = vpop.f32.mrf.mxu1 }
 0x463   :  { %v705_v62 = vmul.f32 0.35355338, %v701_v61 }
 0x465   :  { %v709_v0 = vsel %vm187_vm3, %v705_v62, -inf }
 0x466   :  { %710 = vmax.xlane.f32.xlu2 %v709_v0 }
 0x467   :  { %v392_v18 = vpop.xlane.xlu0 %391 }
 0x46e   :  { %394 = vadd.xlane.f32.xlu1 %v393_v2  ;;  %564 = vadd.xlane.f32.xlu2 %v563_v3 }
 0x476   :  { %719 = vadd.xlane.f32.xlu2 %v718_v5 }
 0x49e   :  { %v556_v27 = vpop.xlane.xlu1 %555 }
 0x49f   :  { %v558_v6 = vsub.f32 %v550_v57, %v556_v27 }
 0x4a1   :  { %v561_v7 = vmul.f32 1.442695, %v558_v6  ;;  %v2871_v6 = vmov 32.0  }
 0x4a3   :  { %2759 = vpow2.f32 %v561_v7 }
 0x4a9   :  { %v2760_v8 = vpop.eup %2759 }
 0x4aa   :  { %2424 = vmatmul.msk.f32.vlgmr.msrb.gmra.mxu3 %vm187_vm3, %v2760_v8  ;;  %v566_v9 = vsel %vm187_vm3, %v2760_v8, 0.0 }
 0x4ab   :  { %567 = vadd.xlane.f32.xlu2 %v566_v9 }
 0x4b6   :  { %v727_v10 = vpop.permute.xlu1 %726 }
 0x4b7   :  { %747 = vmatpush.msra.mxu3 %v727_v10 }
 0x4b8   :  { %2430 = vmatmul.msk.f32.vlgmr.msra.gmra.mxu3 %vm187_vm3, %v2758_v4 }
 0x4d9   :  { %v711_v13 = vpop.xlane.xlu2 %710 }
 0x4da   :  { %v713_v16 = vsub.f32 %v705_v62, %v711_v13 }
 0x4dc   :  { %v716_v17 = vmul.f32 1.442695, %v713_v16 }
 0x4de   :  { %2761 = vpow2.f32 %v716_v17 }
 0x4df   :  { %2763 = vrcp.f32 %v392_v18 }
 0x4e1   :  { %v395_v19 = vpop.xlane.xlu1 %394  ;;  %v565_v31 = vpop.xlane.xlu2 %564 }
 0x4e2   :  { %2765 = vrcp.f32 %v395_v19 }
 0x4e3   :  { %2767 = vrcp.f32 %v565_v31 }
 0x4e4   :  { %v2762_v20 = vpop.eup %2761 }
 0x4e5   :  { %2431 = vmatmul.msk.f32.vlgmr.msrb.gmra.mxu0 %vm187_vm3, %v2762_v20  ;;  %v721_v21 = vsel %vm187_vm3, %v2762_v20, 0.0  ;;  %v2764_v22 = vpop.eup %2763 }
 0x4e6   :  { %722 = vadd.xlane.f32.xlu2 %v721_v21  ;;  %v450_v24 = vmul.f32 %v2764_v22, %v3093_v34  ;;  %v2671_v22 = vld [vmem:[%s3520_s6 + $0x8] sm:$0xff] }
 0x4e7   :  { %898 = vmatpush.bf16.msrb.mxu3 %v2671_v22 }
 0x4e8   :  { %v2766_v23 = vpop.eup %2765 }
 0x4e9   :  { %v451_v25 = vmul.f32 %v2766_v23, %v447_v54  ;;  %v720_v35 = vpop.xlane.xlu2 %719  ;;  %v2768_v37 = vpop.eup %2767 }
 0x4ea   :  { %v623_v34 = vmul.f32 %v2768_v37, %v594_v60 }
 0x4eb   :  { %v452_v26 = vpack.c.bf16 %v451_v25, %v450_v24 }
 0x4ed   :  { %2417 = vmatmul.msk.bf16.vlgmr.msra.gmra.mxu2 %vm187_vm3, %v452_v26  ;;  %v2670_v26 = vld [vmem:[%s3520_s6] sm:$0xff] }
 0x4ee   :  { %899 = vmatpush.bf16.msrb.mxu3 %v2670_v26 }
 0x51e   :  { %v568_v36 = vpop.xlane.xlu2 %567 }
 0x51f   :  { %2769 = vrcp.f32 %v568_v36 }
 0x520   :  { %2771 = vrcp.f32 %v720_v35 }
 0x525   :  { %v2770_v38 = vpop.eup %2769 }
 0x526   :  { %v2772_v47 = vpop.eup %2771 }
 0x52d   :  { %v620_v39 = vpop.f32.mrf.mxu3 }
 0x52e   :  { %v624_v40 = vmul.f32 %v2770_v38, %v620_v39 }
 0x530   :  { %v625_v30 = vpack.c.bf16 %v624_v40, %v623_v34 }
 0x532   :  { %2425 = vmatmul.msk.bf16.vlgmr.msrb.gmra.mxu2 %vm187_vm3, %v625_v30 }
 0x53b   :  { %v749_v46 = vpop.f32.mrf.mxu3 }
 0x53c   :  { %v778_v50 = vmul.f32 %v2772_v47, %v749_v46  ;;  %v2722_v47 = vld [vmem:[%s3526_s12 + $0x6] ss:$0 sm:$0xff] }
 0x559   :  { %v723_v45 = vpop.xlane.xlu2 %722 }
 0x55a   :  { %2773 = vrcp.f32 %v723_v45 }
 0x55b   :  { %2775 = vrcp.f32 %v2871_v6 }
 0x560   :  { %v2774_v48 = vpop.eup %2773 }
 0x561   :  { %v2776_v7 = vpop.eup %2775 }
 0x562   :  { %v775_v49 = vpop.f32.mrf.mxu0  ;;  %v818_v8 = vmul.f32 32.0, %v2776_v7  ;;  %vm822_vm6 = vweird.f32 %v2776_v7 }
 0x563   :  { %v779_v51 = vmul.f32 %v2774_v48, %v775_v49 }
 0x564   :  { %v819_v9 = vsub.f32 1.0, %v818_v8 }
 0x565   :  { %v780_v52 = vpack.c.bf16 %v779_v51, %v778_v50  ;;  %v2723_v51 = vld [vmem:[%s3526_s12 + $0x7] ss:$0 sm:$0xff] }
 0x567   :  { %2432 = vmatmul.msk.bf16.vlgmr.msrb.gmra.mxu1 %vm187_vm3, %v780_v52 }
 0x570   :  { %v468_v53 = vpop.f32.mrf.mxu2 }
 0x571   :  { %v489_v57 = vadd.f32 %v3099_v41, %v468_v53 }
 0x578   :  { %v470_v54 = vpop.f32.mrf.mxu2 }
 0x579   :  { %v491_v63 = vadd.f32 %v3102_v43, %v470_v54  ;;  %v820_v43 = vmul.f32 %v2776_v7, %v819_v9 }
 0x57b   :  { %v821_v10 = vadd.f32 %v2776_v7, %v820_v43 }
 0x5b5   :  { %v641_v56 = vpop.f32.mrf.mxu2 }
 0x5b6   :  { %v646_v55 = vadd.f32 %v641_v56, %v489_v57 }
 0x5bd   :  { %v643_v62 = vpop.f32.mrf.mxu2 }
 0x5be   :  { %v647_v1 = vadd.f32 %v643_v62, %v491_v63  ;;  %v2724_v63 = vld [vmem:[%s3525_s11] ss:$0 sm:$0xff] }
 0x5e4   :  { %v796_v59 = vpop.f32.mrf.mxu1 }
 0x5e5   :  { %v801_v60 = vadd.f32 %v796_v59, %v646_v55  ;;  %v2674_v59 = vld [vmem:[%s3521_s7 + $0x10] sm:$0xff] }
 0x5e7   :  { %v805_v61 = vadd.f32 %v2721_v58, %v801_v60  ;;  %v2673_v60 = vld [vmem:[%s3521_s7 + $0x8] sm:$0xff] }
 0x5e9   :  { %v807_v0 = vadd.f32 %v805_v61, %v2971_v14  ;;  %v3148_v14 = vsel %vm822_vm6, %v2776_v7, %v821_v10  ;;  %v2672_v61 = vld [vmem:[%s3521_s7] sm:$0xff] }
 0x5ea   :  { %v2725_v7 = vld [vmem:[%s3526_s12 + $0x4] ss:$0 sm:$0xff] }
 0x5eb   :  { %v811_v2 = vsel %vm142_vm2, %v807_v0, 0.0 }
 0x5ec   :  { %v798_v3 = vpop.f32.mrf.mxu1  ;;  %812 = vadd.xlane.f32.xlu2 %v811_v2 }
 0x5ed   :  { %v802_v4 = vadd.f32 %v798_v3, %v647_v1 }
 0x5ef   :  { %v806_v41 = vadd.f32 %v2721_v58, %v802_v4  ;;  %v2675_v58 = vld [vmem:[%s3521_s7 + $0x18] sm:$0xff] }
 0x5f0   :  { %951 = vmatpush.bf16.msra.mxu2 %v2675_v58 }
 0x5f1   :  { %v808_v5 = vadd.f32 %v806_v41, %v2973_v15 }
 0x5f3   :  { %v814_v27 = vsel %vm142_vm2, %v808_v5, 0.0 }
 0x5f4   :  { %815 = vadd.xlane.f32.xlu0 %v814_v27  ;;  %952 = vmatpush.bf16.msra.mxu2 %v2674_v59  ;;  %v2676_v27 = vld [vmem:[%s3522_s8] sm:$0xff]  ;;  %v2727_v59 = vld [vmem:[%s3526_s12 + $0x8] ss:$0 sm:$0xff] }
 0x5f8   :  { %953 = vmatpush.bf16.msra.mxu2 %v2673_v60 }
 0x5fc   :  { %954 = vmatpush.bf16.msra.mxu2 %v2672_v61 }
 0x65f   :  { %v813_v11 = vpop.xlane.xlu2 %812 }
 0x660   :  { %v824_v12 = vmul.f32 %v3148_v14, %v813_v11  ;;  %v2726_v11 = vld [vmem:[%s3526_s12 + $0x5] ss:$0 sm:$0xff] }
 0x662   :  { %v826_v13 = vsub.f32 %v807_v0, %v824_v12 }
 0x664   :  { %v828_v16 = vmul.f32 %v826_v13, %v826_v13 }
 0x666   :  { %v830_v15 = vsel %vm142_vm2, %v828_v16, 0.0 }
 0x667   :  { %831 = vadd.xlane.f32.xlu1 %v830_v15  ;;  %v816_v17 = vpop.xlane.xlu0 %815 }
 0x668   :  { %v825_v18 = vmul.f32 %v3148_v14, %v816_v17 }
 0x66a   :  { %v827_v19 = vsub.f32 %v808_v5, %v825_v18  ;;  %v2677_v5 = vld [vmem:[%s3522_s8 + $0x8] sm:$0xff] }
 0x66b   :  { %987 = vmatpush.bf16.msra.mxu0 %v2677_v5  ;;  %v2730_v5 = vld [vmem:[%s3526_s12 + $0xa] ss:$0 sm:$0xff] }
 0x66c   :  { %v829_v20 = vmul.f32 %v827_v19, %v827_v19 }
 0x66e   :  { %v833_v21 = vsel %vm142_vm2, %v829_v20, 0.0 }
 0x66f   :  { %834 = vadd.xlane.f32.xlu2 %v833_v21  ;;  %988 = vmatpush.bf16.msra.mxu0 %v2676_v27 }
 0x6da   :  { %v832_v23 = vpop.xlane.xlu1 %831 }
 0x6db   :  { %v836_v24 = vmul.f32 %v832_v23, %v3148_v14 }
 0x6dd   :  { %v838_v25 = vadd.f32 1e-05, %v836_v24 }
 0x6df   :  { %2777 = vrsqrt.f32 %v838_v25  ;;  %vm846_vm8 = vweird.f32 %v838_v25 }
 0x6e2   :  { %v835_v28 = vpop.xlane.xlu2 %834 }
 0x6e3   :  { %v837_v29 = vmul.f32 %v835_v28, %v3148_v14 }
 0x6e5   :  { %v2778_v31 = vpop.eup %2777  ;;  %v839_v35 = vadd.f32 1e-05, %v837_v29 }
 0x6e6   :  { %v841_v36 = vmul.f32 %v2778_v31, %v838_v25  ;;  %vm847_vm7 = vweird.f32 %v2778_v31 }
 0x6e7   :  { %2779 = vrsqrt.f32 %v839_v35  ;;  %vm848_vm9 = vmor %vm846_vm8, %vm847_vm7  ;;  %vm856_vm11 = vweird.f32 %v839_v35 }
 0x6e8   :  { %v842_v37 = vmul.f32 %v2778_v31, %v841_v36 }
 0x6ea   :  { %v843_v38 = vmul.f32 0.5, %v842_v37 }
 0x6ec   :  { %v844_v39 = vsub.f32 1.5, %v843_v38  ;;  %v2679_v38 = vld [vmem:[%s3518_s4 + $0x18] sm:$0xff] }
 0x6ed   :  { %v2780_v34 = vpop.eup %2779  ;;  %1080 = vmatpush.bf16.msra.mxu1 %v2679_v38 }
 0x6ee   :  { %v845_v40 = vmul.f32 %v2778_v31, %v844_v39  ;;  %v851_v30 = vmul.f32 %v2780_v34, %v839_v35  ;;  %vm857_vm10 = vweird.f32 %v2780_v34 }
 0x6ef   :  { %vm858_vm12 = vmor %vm856_vm11, %vm857_vm10 }
 0x6f0   :  { %v852_v42 = vmul.f32 %v2780_v34, %v851_v30  ;;  %v849_v44 = vsel %vm848_vm9, %v2778_v31, %v845_v40  ;;  %v2678_v30 = vld [vmem:[%s3518_s4 + $0x10] sm:$0xff] }
 0x6f1   :  { %v860_v48 = vmul.f32 %v849_v44, %v826_v13  ;;  %1081 = vmatpush.bf16.msra.mxu1 %v2678_v30 }
 0x6f2   :  { %v853_v45 = vmul.f32 0.5, %v852_v42  ;;  %v2729_v42 = vld [vmem:[%s3526_s12 + $0xb] ss:$0 sm:$0xff] }
 0x6f3   :  { %v863_v52 = vmul.f32 %v2722_v47, %v860_v48 }
 0x6f4   :  { %v854_v46 = vsub.f32 1.5, %v853_v45 }
 0x6f5   :  { %v866_v56 = vadd.f32 %v2723_v51, %v863_v52 }
 0x6f6   :  { %v855_v49 = vmul.f32 %v2780_v34, %v854_v46 }
 0x6f8   :  { %v859_v50 = vsel %vm858_vm12, %v2780_v34, %v855_v49 }
 0x6f9   :  { %v861_v53 = vmul.f32 %v859_v50, %v827_v19 }
 0x6fb   :  { %v864_v54 = vmul.f32 %v2722_v47, %v861_v53 }
 0x6fd   :  { %v867_v57 = vadd.f32 %v2723_v51, %v864_v54 }
 0x6ff   :  { %v868_v55 = vpack.c.bf16 %v867_v57, %v866_v56 }
 0x701   :  { %2441 = vmatmul.msk.bf16.vlgmr.msrb.gmra.mxu3 %vm142_vm2, %v868_v55 }
 0x784   :  { %v901_v62 = vpop.f32.mrf.mxu3 }
 0x785   :  { %v902_v0 = vadd.f32 %v2724_v63, %v901_v62 }
 0x787   :  { %v906_v3 = vmax.f32 %v902_v0, 0.0 }
 0x78c   :  { %v903_v1 = vpop.f32.mrf.mxu3 }
 0x78d   :  { %v904_v2 = vadd.f32 %v2724_v63, %v903_v1  ;;  %v2728_v63 = vld [vmem:[%s3526_s12 + $0x9] ss:$0 sm:$0xff] }
 0x78f   :  { %v907_v4 = vmax.f32 %v904_v2, 0.0 }
 0x791   :  { %v908_v41 = vpack.c.bf16 %v907_v4, %v906_v3 }
 0x793   :  { %2458 = vmatmul.msk.bf16.vlgmr.msra.gmra.mxu2 %vm943_vm13, %v908_v41 }
 0x816   :  { %v956_v6 = vpop.f32.mrf.mxu2 }
 0x817   :  { %v957_v9 = vadd.f32 %v2725_v7, %v956_v6 }
 0x81e   :  { %v958_v8 = vpop.f32.mrf.mxu2 }
 0x81f   :  { %v959_v43 = vadd.f32 %v2725_v7, %v958_v8 }
 0x821   :  { %v961_v10 = vpack.c.bf16 %v959_v43, %v957_v9  ;;  %v2731_v9 = vld [vmem:[%s3526_s12 + $0xc] ss:$0 sm:$0xff] }
 0x823   :  { %2467 = vmatmul.msk.bf16.vlgmr.msra.gmra.mxu0 %vm142_vm2, %v961_v10 }
 0x8a0   :  { %v990_v12 = vpop.f32.mrf.mxu0 }
 0x8a1   :  { %v991_v13 = vadd.f32 %v990_v12, %v3089_v32 }
 0x8a3   :  { %v997_v16 = vadd.f32 %v2726_v11, %v991_v13 }
 0x8a5   :  { %v999_v15 = vadd.f32 %v997_v16, %v866_v56 }
 0x8a7   :  { %v1003_v17 = vsel %vm142_vm2, %v999_v15, 0.0 }
 0x8a8   :  { %v992_v18 = vpop.f32.mrf.mxu0  ;;  %1004 = vadd.xlane.f32.xlu0 %v1003_v17 }
 0x8a9   :  { %v993_v19 = vadd.f32 %v992_v18, %v3091_v33 }
 0x8ab   :  { %v998_v20 = vadd.f32 %v2726_v11, %v993_v19 }
 0x8ad   :  { %v1000_v21 = vadd.f32 %v998_v20, %v867_v57 }
 0x8af   :  { %v1006_v22 = vsel %vm142_vm2, %v1000_v21, 0.0 }
 0x8b0   :  { %1007 = vadd.xlane.f32.xlu1 %v1006_v22 }
 0x8c9   :  { %1095 = vrot.lane.b32.xlu1 %v2729_v42, %s2859_s0 }
 0x91b   :  { %v1005_v23 = vpop.xlane.xlu0 %1004 }
 0x91c   :  { %v1009_v24 = vmul.f32 %v1005_v23, %v3148_v14 }
 0x91e   :  { %v1011_v25 = vsub.f32 %v999_v15, %v1009_v24 }
 0x920   :  { %v1013_v26 = vmul.f32 %v1011_v25, %v1011_v25 }
 0x922   :  { %v1015_v28 = vsel %vm142_vm2, %v1013_v26, 0.0 }
 0x923   :  { %v1008_v29 = vpop.xlane.xlu1 %1007  ;;  %1016 = vadd.xlane.f32.xlu2 %v1015_v28 }
 0x924   :  { %v1010_v31 = vmul.f32 %v1008_v29, %v3148_v14 }
 0x926   :  { %v1012_v35 = vsub.f32 %v1000_v21, %v1010_v31 }
 0x928   :  { %v1014_v36 = vmul.f32 %v1012_v35, %v1012_v35 }
 0x92a   :  { %v1018_v37 = vsel %vm142_vm2, %v1014_v36, 0.0 }
 0x92b   :  { %1019 = vadd.xlane.f32.xlu0 %v1018_v37 }
 0x93b   :  { %v1096_v27 = vpop.permute.xlu1 %1095 }
 0x996   :  { %v1017_v39 = vpop.xlane.xlu2 %1016 }
 0x997   :  { %v1021_v34 = vmul.f32 %v1017_v39, %v3148_v14 }
 0x999   :  { %v1023_v40 = vadd.f32 1e-05, %v1021_v34 }
 0x99b   :  { %2781 = vrsqrt.f32 %v1023_v40  ;;  %vm1031_vm15 = vweird.f32 %v1023_v40 }
 0x99e   :  { %v1020_v44 = vpop.xlane.xlu0 %1019 }
 0x99f   :  { %v1022_v45 = vmul.f32 %v1020_v44, %v3148_v14 }
 0x9a1   :  { %v2782_v46 = vpop.eup %2781  ;;  %v1024_v47 = vadd.f32 1e-05, %v1022_v45 }
 0x9a2   :  { %v1026_v48 = vmul.f32 %v2782_v46, %v1023_v40  ;;  %vm1032_vm14 = vweird.f32 %v2782_v46 }
 0x9a3   :  { %2783 = vrsqrt.f32 %v1024_v47  ;;  %vm1033_vm0 = vmor %vm1031_vm15, %vm1032_vm14  ;;  %vm1041_vm5 = vweird.f32 %v1024_v47 }
 0x9a4   :  { %v1027_v49 = vmul.f32 %v2782_v46, %v1026_v48 }
 0x9a6   :  { %v1028_v50 = vmul.f32 0.5, %v1027_v49 }
 0x9a8   :  { %v1029_v51 = vsub.f32 1.5, %v1028_v50 }
 0x9a9   :  { %v2784_v52 = vpop.eup %2783 }
 0x9aa   :  { %v1030_v53 = vmul.f32 %v2782_v46, %v1029_v51  ;;  %v1036_v54 = vmul.f32 %v2784_v52, %v1024_v47  ;;  %vm1042_vm1 = vweird.f32 %v2784_v52 }
 0x9ab   :  { %vm1043_vm6 = vmor %vm1041_vm5, %vm1042_vm1 }
 0x9ac   :  { %v1037_v56 = vmul.f32 %v2784_v52, %v1036_v54  ;;  %v1034_v57 = vsel %vm1033_vm0, %v2782_v46, %v1030_v53  ;;  %v2481_v46 = vld [vmem:[%s3519_s5 + $0x10] sm:$0xf] }
 0x9ad   :  { %v1045_v60 = vmul.f32 %v1034_v57, %v1011_v25  ;;  %v1405_v47 = vsel %vm107_vm4, %v2481_v46, 0 }
 0x9ae   :  { %v1038_v55 = vmul.f32 0.5, %v1037_v56 }
 0x9af   :  { %v1048_v0 = vmul.f32 %v2727_v59, %v1045_v60 }
 0x9b0   :  { %v1039_v58 = vsub.f32 1.5, %v1038_v55 }
 0x9b1   :  { %v3224_v3 = vadd.f32 %v2728_v63, %v1048_v0 }
 0x9b2   :  { %v1040_v61 = vmul.f32 %v2784_v52, %v1039_v58 }
 0x9b4   :  { %v1044_v62 = vsel %vm1043_vm6, %v2784_v52, %v1040_v61 }
 0x9b5   :  { %v1046_v1 = vmul.f32 %v1044_v62, %v1012_v35 }
 0x9b7   :  { %v1049_v2 = vmul.f32 %v2727_v59, %v1046_v1 }
 0x9b9   :  { %v3226_v4 = vadd.f32 %v2728_v63, %v1049_v2 }
 0x9bb   :  { %v1053_v41 = vpack.c.bf16 %v3226_v4, %v3224_v3 }
 0x9bd   :  { %2480 = vmatmul.msk.bf16.vlgmr.msra.gmra.mxu1 %vm142_vm2, %v1053_v41 }
 0xa3a   :  { %v1083_v6 = vpop.f32.mrf.mxu1 }
 0xa3b   :  { %v1090_v7 = vadd.f32 %v2730_v5, %v1083_v6  ;;  %v1098_v8 = vadd.f32 %v1096_v27, %v1083_v6 }
 0xa3d   :  { %1114 = vrot.lane.b32.xlu2 %v1098_v8, %s2861_s2  ;;  %1248 = vrot.lane.b32.xlu1 %v1090_v7, %s2862_s28 }
 0xa42   :  { %v1085_v43 = vpop.f32.mrf.mxu1 }
 0xa43   :  { %v3239_v10 = vadd.f32 %v1096_v27, %v1085_v43  ;;  %v3253_v16 = vadd.f32 %v2730_v5, %v1085_v43 }
 0xa45   :  { %1103 = vrot.lane.b32.xlu2 %v2731_v9, %s2863_s14  ;;  %1142 = vrot.lane.b32.xlu0 %v3239_v10, %s2861_s2 }
 0xa4d   :  { %1278 = vrot.lane.b32.xlu2 %v3239_v10, %s2860_s25  ;;  %1250 = vrot.lane.b32.xlu0 %v1098_v8, %s2860_s25  ;;  %s2373_s25 = sshll.u32 %s3527_s13, 4  ;;  %s2374_s25 = int_to_ptr.hbm [resolvable:$true] %s2373_s25 }
 0xa97   :  { %v1115_v11 = vpop.permute.xlu2 %1114 }
 0xa98   :  { %2485 = vmatpush.xpose.msk.msra.mxu3 %vm187_vm3, %v1115_v11 }
 0xa9b   :  { %2486 = vmatmul.msk.f32.vlgmr.msra.gmra.mxu3 %vm187_vm3, %v1090_v7 }
 0xa9f   :  { %v1104_v12 = vpop.permute.xlu2 %1103 }
 0xaa0   :  { %v3249_v13 = vadd.f32 %v1104_v12, %v1083_v6  ;;  %v3269_v28 = vadd.f32 %v1104_v12, %v1085_v43 }
 0xaa2   :  { %1192 = vrot.lane.b32.xlu1 %v3249_v13, %s2863_s14 }
 0xaa7   :  { %v1279_v20 = vpop.permute.xlu2 %1278 }
 0xaaa   :  { %1276 = vrot.lane.b32.xlu1 %v3253_v16, %s2862_s28 }
 0xaaf   :  { %v1249_v18 = vpop.permute.xlu1 %1248 }
 0xab2   :  { %1326 = vrot.lane.b32.xlu1 %v3249_v13, %s2864_s15 }
 0xab7   :  { %v1143_v15 = vpop.permute.xlu0 %1142 }
 0xab8   :  { %2487 = vmatpush.xpose.msk.msrb.mxu2 %vm187_vm3, %v1143_v15 }
 0xaba   :  { %1423 = vrot.lane.b32.xlu1 %v1098_v8, %s2865_s16 }
 0xabb   :  { %2488 = vmatmul.msk.f32.vlgmr.msrb.gmra.mxu2 %vm187_vm3, %v3253_v16 }
 0xabf   :  { %v1251_v17 = vpop.permute.xlu0 %1250 }
 0xac0   :  { %2491 = vmatpush.xpose.msk.msra.mxu2 %vm187_vm3, %v1251_v17 }
 0xac2   :  { %1421 = vrot.lane.b32.xlu1 %v1090_v7, %s2866_s17 }
 0xac3   :  { %2492 = vmatmul.msk.f32.vlgmr.msra.gmra.mxu2 %vm187_vm3, %v1249_v18 }
 0xb14   :  { %v1193_v19 = vpop.permute.xlu1 %1192 }
 0xb15   :  { %1213 = vmatpush.msrb.mxu0 %v1193_v19 }
 0xb17   :  { %2493 = vmatpush.xpose.msk.msra.mxu0 %vm187_vm3, %v1279_v20 }
 0xb1c   :  { %v1277_v21 = vpop.permute.xlu1 %1276 }
 0xb1e   :  { %v1138_v22 = vpop.f32.mrf.mxu3 }
 0xb1f   :  { %v1169_v23 = vmul.f32 0.35355338, %v1138_v22 }
 0xb21   :  { %v1171_v24 = vsel %vm187_vm3, %v1169_v23, -inf }
 0xb22   :  { %1172 = vmax.xlane.f32.xlu0 %v1171_v24 }
 0xb24   :  { %v1327_v25 = vpop.permute.xlu1 %1326 }
 0xb25   :  { %1347 = vmatpush.msrb.mxu1 %v1327_v25 }
 0xb2c   :  { %v1424_v26 = vpop.permute.xlu1 %1423 }
 0xb2d   :  { %2499 = vmatpush.xpose.msk.msra.mxu1 %vm187_vm3, %v1424_v26 }
 0xb34   :  { %v1422_v45 = vpop.permute.xlu1 %1421 }
 0xb36   :  { %1219 = vrot.lane.b32.xlu0 %v3269_v28, %s2863_s14 }
 0xb3e   :  { %v1166_v29 = vpop.f32.mrf.mxu2 }
 0xb3f   :  { %v1170_v31 = vmul.f32 0.35355338, %v1166_v29 }
 0xb41   :  { %v1174_v35 = vsel %vm187_vm3, %v1170_v31, -inf }
 0xb42   :  { %1175 = vmax.xlane.f32.xlu1 %v1174_v35 }
 0xb46   :  { %v1273_v36 = vpop.f32.mrf.mxu2 }
 0xb47   :  { %v1304_v37 = vmul.f32 0.35355338, %v1273_v36 }
 0xb49   :  { %v1306_v38 = vsel %vm187_vm3, %v1304_v37, -inf }
 0xb4a   :  { %1307 = vmax.xlane.f32.xlu2 %v1306_v38 }
 0xb5b   :  { %1451 = vrot.lane.b32.xlu1 %v3239_v10, %s2865_s16 }
 0xb62   :  { %1352 = vrot.lane.b32.xlu2 %v3269_v28, %s2864_s15 }
 0xb63   :  { %1578 = vrot.lane.b32.xlu1 %v1098_v8, %s2867_s1 }
 0xb6b   :  { %1576 = vrot.lane.b32.xlu1 %v1090_v7, %s2868_s9 }
 0xb73   :  { %1604 = vrot.lane.b32.xlu1 %v3253_v16, %s2868_s9 }
 0xb95   :  { %v1173_v39 = vpop.xlane.xlu0 %1172 }
 0xb96   :  { %v1177_v34 = vsub.f32 %v1169_v23, %v1173_v39 }
 0xb98   :  { %v1179_v40 = vmul.f32 1.442695, %v1177_v34 }
 0xb9a   :  { %2785 = vpow2.f32 %v1179_v40 }
 0xba0   :  { %v2786_v30 = vpop.eup %2785 }
 0xba1   :  { %2489 = vmatmul.msk.f32.vlgmr.msrb.gmra.mxu0 %vm187_vm3, %v2786_v30  ;;  %v1183_v42 = vsel %vm187_vm3, %v2786_v30, 0.0 }
 0xba2   :  { %1184 = vadd.xlane.f32.xlu2 %v1183_v42  ;;  %1414 = vmatpush.bf16.msrb.mxu0 %v1405_v47 }
 0xba8   :  { %v1220_v44 = vpop.permute.xlu0 %1219 }
 0xba9   :  { %1240 = vmatpush.msrb.mxu3 %v1220_v44  ;;  %2494 = vmatmul.msk.f32.vlgmr.msra.gmra.mxu0 %vm187_vm3, %v1277_v21 }
 0xbb5   :  { %v1176_v48 = vpop.xlane.xlu1 %1175 }
 0xbb6   :  { %v1178_v49 = vsub.f32 %v1170_v31, %v1176_v48 }
 0xbb8   :  { %v1181_v50 = vmul.f32 1.442695, %v1178_v49 }
 0xbba   :  { %2787 = vpow2.f32 %v1181_v50 }
 0xbbd   :  { %v1308_v51 = vpop.xlane.xlu2 %1307 }
 0xbbe   :  { %v1312_v52 = vsub.f32 %v1304_v37, %v1308_v51 }
 0xbc0   :  { %v2788_v53 = vpop.eup %2787  ;;  %v1314_v54 = vmul.f32 1.442695, %v1312_v52 }
 0xbc1   :  { %2490 = vmatmul.msk.f32.vlgmr.msrb.gmra.mxu3 %vm187_vm3, %v2788_v53  ;;  %v1186_v56 = vsel %vm187_vm3, %v2788_v53, 0.0 }
 0xbc2   :  { %2789 = vpow2.f32 %v1314_v54  ;;  %1187 = vadd.xlane.f32.xlu0 %v1186_v56 }
 0xbc5   :  { %v1353_v57 = vpop.permute.xlu2 %1352 }
 0xbc6   :  { %1373 = vmatpush.msra.mxu3 %v1353_v57 }
 0xbc8   :  { %v3292_v55 = vpop.eup %2789 }
 0xbc9   :  { %2495 = vmatmul.msk.f32.vlgmr.msrb.gmra.mxu1 %vm187_vm3, %v3292_v55  ;;  %v1318_v50 = vsel %vm187_vm3, %v3292_v55, 0.0 }
 0xbcd   :  { %v1452_v58 = vpop.permute.xlu1 %1451 }
 0xbce   :  { %2501 = vmatpush.xpose.msk.msrb.mxu3 %vm187_vm3, %v1452_v58 }
 0xbd1   :  { %2500 = vmatmul.msk.f32.vlgmr.msra.gmra.mxu1 %vm187_vm3, %v1422_v45 }
 0xbd5   :  { %v1579_v59 = vpop.permute.xlu1 %1578 }
 0xbd6   :  { %1499 = vrot.lane.b32.xlu0 %v3249_v13, %s2869_s3  ;;  %2506 = vmatpush.xpose.msk.msra.mxu0 %vm187_vm3, %v1579_v59  ;;  %v2482_v59 = vld [vmem:[%s3519_s5 + $0x14] sm:$0xf] }
 0xbdd   :  { %v1577_v43 = vpop.permute.xlu1 %1576 }
 0xbde   :  { %1606 = vrot.lane.b32.xlu0 %v3239_v10, %s2867_s1 }
 0xbe5   :  { %v1605_v37 = vpop.permute.xlu1 %1604 }
 0xc15   :  { %v1185_v0 = vpop.xlane.xlu2 %1184 }
 0xc16   :  { %2791 = vrcp.f32 %v1185_v0 }
 0xc1c   :  { %v2792_v2 = vpop.eup %2791 }
 0xc1e   :  { %v1215_v60 = vpop.f32.mrf.mxu0 }
 0xc1f   :  { %v1245_v27 = vmul.f32 %v2792_v2, %v1215_v60  ;;  %v1385_v60 = vsel %vm107_vm4, %v2482_v59, 0 }
 0xc20   :  { %1394 = vmatpush.bf16.msrb.mxu2 %v1385_v60 }
 0xc26   :  { %v1301_v61 = vpop.f32.mrf.mxu0 }
 0xc27   :  { %v1305_v62 = vmul.f32 0.35355338, %v1301_v61 }
 0xc29   :  { %v1309_v63 = vsel %vm187_vm3, %v1305_v62, -inf }
 0xc2a   :  { %1310 = vmax.xlane.f32.xlu2 %v1309_v63 }
 0xc35   :  { %v1188_v1 = vpop.xlane.xlu0 %1187 }
 0xc36   :  { %2793 = vrcp.f32 %v1188_v1 }
 0xc3c   :  { %v2794_v41 = vpop.eup %2793 }
 0xc42   :  { %1449 = vrot.lane.b32.xlu2 %v3253_v16, %s2866_s17 }
 0xc44   :  { %v1242_v5 = vpop.f32.mrf.mxu3 }
 0xc45   :  { %v1246_v6 = vmul.f32 %v2794_v41, %v1242_v5 }
 0xc46   :  { %v3308_v10 = vpop.f32.mrf.mxu1 }
 0xc47   :  { %v1247_v7 = vpack.c.bf16 %v1246_v6, %v1245_v27 }
 0xc48   :  { %v1500_v8 = vpop.permute.xlu0 %1499 }
 0xc49   :  { %2498 = vmatmul.msk.bf16.vlgmr.msrb.gmra.mxu0 %vm187_vm3, %v1247_v7  ;;  %1520 = vmatpush.msrb.mxu1 %v1500_v8 }
 0xc4e   :  { %v1446_v11 = vpop.f32.mrf.mxu1 }
 0xc4f   :  { %v1477_v12 = vmul.f32 0.35355338, %v1446_v11 }
 0xc50   :  { %v1607_v9 = vpop.permute.xlu0 %1606 }
 0xc51   :  { %2508 = vmatpush.xpose.msk.msra.mxu1 %vm187_vm3, %v1607_v9  ;;  %v1479_v16 = vsel %vm187_vm3, %v1477_v12, -inf  ;;  %v2483_v9 = vld [vmem:[%s3519_s5 + $0x18] sm:$0xf] }
 0xc59   :  { %2507 = vmatmul.msk.f32.vlgmr.msra.gmra.mxu0 %vm187_vm3, %v1577_v43  ;;  %v1558_v43 = vsel %vm107_vm4, %v2483_v9, 0 }
 0xc5a   :  { %1567 = vmatpush.bf16.msra.mxu2 %v1558_v43 }
 0xc6b   :  { %1480 = vmax.xlane.f32.xlu2 %v1479_v16 }
 0xc83   :  { %1525 = vrot.lane.b32.xlu2 %v3269_v28, %s2869_s3 }
 0xc9d   :  { %v1311_v15 = vpop.xlane.xlu2 %1310 }
 0xc9e   :  { %v1313_v17 = vsub.f32 %v1305_v62, %v1311_v15 }
 0xca0   :  { %v1316_v18 = vmul.f32 1.442695, %v1313_v17 }
 0xca2   :  { %2795 = vpow2.f32 %v1316_v18 }
 0xca5   :  { %v1450_v20 = vpop.permute.xlu2 %1449 }
 0xca8   :  { %v2796_v19 = vpop.eup %2795 }
 0xca9   :  { %2496 = vmatmul.msk.f32.vlgmr.msra.gmra.mxu3 %vm187_vm3, %v2796_v19  ;;  %v1321_v38 = vsel %vm187_vm3, %v2796_v19, 0.0 }
 0xcb1   :  { %2502 = vmatmul.msk.f32.vlgmr.msrb.gmra.mxu3 %vm187_vm3, %v1450_v20 }
 0xcc6   :  { %v3316_v21 = vpop.f32.mrf.mxu0 }
 0xcce   :  { %v3318_v22 = vpop.f32.mrf.mxu0 }
 0xcd6   :  { %v1601_v23 = vpop.f32.mrf.mxu0 }
 0xcd7   :  { %v1632_v24 = vmul.f32 0.35355338, %v1601_v23  ;;  %v2484_v23 = vld [vmem:[%s3519_s5 + $0x1c] sm:$0xf] }
 0xcd9   :  { %v1634_v25 = vsel %vm187_vm3, %v1632_v24, -inf }
 0xcda   :  { %1635 = vmax.xlane.f32.xlu1 %v1634_v25 }
 0xcde   :  { %v1481_v26 = vpop.xlane.xlu2 %1480 }
 0xcdf   :  { %v1485_v29 = vsub.f32 %v1477_v12, %v1481_v26 }
 0xce1   :  { %v1487_v31 = vmul.f32 1.442695, %v1485_v29 }
 0xce3   :  { %2797 = vpow2.f32 %v1487_v31 }
 0xce6   :  { %v1526_v35 = vpop.permute.xlu2 %1525 }
 0xce7   :  { %1546 = vmatpush.msra.mxu3 %v1526_v35 }
 0xce9   :  { %v2798_v36 = vpop.eup %2797 }
 0xcea   :  { %2503 = vmatmul.msk.f32.vlgmr.msrb.gmra.mxu1 %vm187_vm3, %v2798_v36  ;;  %v1491_v51 = vsel %vm187_vm3, %v2798_v36, 0.0 }
 0xcf2   :  { %2509 = vmatmul.msk.f32.vlgmr.msra.gmra.mxu1 %vm187_vm3, %v1605_v37 }
 0xcf3   :  { %1680 = vrot.lane.b32.xlu1 %v3269_v28, %s2870_s18 }
 0xd1d   :  { %1322 = vadd.xlane.f32.xlu1 %v1321_v38 }
 0xd2c   :  { %v1375_v39 = vpop.f32.mrf.mxu3 }
 0xd34   :  { %v1474_v34 = vpop.f32.mrf.mxu3 }
 0xd35   :  { %v1478_v40 = vmul.f32 0.35355338, %v1474_v34 }
 0xd37   :  { %v1482_v30 = vsel %vm187_vm3, %v1478_v40, -inf }
 0xd38   :  { %1483 = vmax.xlane.f32.xlu0 %v1482_v30 }
 0xd4c   :  { %1654 = vrot.lane.b32.xlu0 %v3249_v13, %s2870_s18 }
 0xd4d   :  { %v1636_v42 = vpop.xlane.xlu1 %1635 }
 0xd4e   :  { %v1640_v48 = vsub.f32 %v1632_v24, %v1636_v42  ;;  %v1713_v24 = vsel %vm107_vm4, %v2484_v23, 0  ;;  %v2734_v23 = vld [vmem:[%s3526_s12 + $0x11] ss:$0 sm:$0xff] }
 0xd4f   :  { %1722 = vmatpush.bf16.msrb.mxu1 %v1713_v24 }
 0xd50   :  { %v1642_v49 = vmul.f32 1.442695, %v1640_v48 }
 0xd52   :  { %2799 = vpow2.f32 %v1642_v49 }
 0xd58   :  { %v2800_v13 = vpop.eup %2799 }
 0xd59   :  { %v1646_v52 = vsel %vm187_vm3, %v2800_v13, 0.0 }
 0xd65   :  { %v1681_v44 = vpop.permute.xlu1 %1680 }
 0xd66   :  { %1701 = vmatpush.msrb.mxu0 %v1681_v44  ;;  %v2732_v44 = vld [vmem:[%s3526_s12 + $0xd] ss:$0 sm:$0xff] }
 0xd67   :  { %v1522_v45 = vpop.f32.mrf.mxu1 }
 0xd6f   :  { %v1629_v46 = vpop.f32.mrf.mxu1 }
 0xd70   :  { %v1633_v47 = vmul.f32 0.35355338, %v1629_v46 }
 0xd72   :  { %v1637_v28 = vsel %vm187_vm3, %v1633_v47, -inf }
 0xd73   :  { %1638 = vmax.xlane.f32.xlu2 %v1637_v28 }
 0xd76   :  { %1319 = vadd.xlane.f32.xlu0 %v1318_v50 }
 0xd7b   :  { %1492 = vadd.xlane.f32.xlu2 %v1491_v51 }
 0xd83   :  { %1647 = vadd.xlane.f32.xlu2 %v1646_v52 }
 0xd90   :  { %v1323_v61 = vpop.xlane.xlu1 %1322 }
 0xdab   :  { %v1484_v53 = vpop.xlane.xlu0 %1483 }
 0xdac   :  { %v1486_v54 = vsub.f32 %v1478_v40, %v1484_v53 }
 0xdae   :  { %v1489_v56 = vmul.f32 1.442695, %v1486_v54 }
 0xdb0   :  { %2801 = vpow2.f32 %v1489_v56 }
 0xdb1   :  { %2803 = vrcp.f32 %v1323_v61 }
 0xdb6   :  { %v2802_v57 = vpop.eup %2801 }
 0xdb7   :  { %2504 = vmatmul.msk.f32.vlgmr.msra.gmra.mxu3 %vm187_vm3, %v2802_v57  ;;  %v1494_v58 = vsel %vm187_vm3, %v2802_v57, 0.0  ;;  %v2804_v2 = vpop.eup %2803 }
 0xdb8   :  { %1495 = vadd.xlane.f32.xlu2 %v1494_v58  ;;  %v1379_v27 = vmul.f32 %v2804_v2, %v1375_v39 }
 0xdbe   :  { %v1655_v55 = vpop.permute.xlu0 %1654 }
 0xdbf   :  { %1675 = vmatpush.msrb.mxu3 %v1655_v55 }
 0xdc0   :  { %2510 = vmatmul.msk.f32.vlgmr.msrb.gmra.mxu3 %vm187_vm3, %v2800_v13 }
 0xde6   :  { %v1639_v62 = vpop.xlane.xlu2 %1638 }
 0xde7   :  { %v1641_v63 = vsub.f32 %v1633_v47, %v1639_v62 }
 0xde9   :  { %v1644_v0 = vmul.f32 1.442695, %v1641_v63  ;;  %v1320_v1 = vpop.xlane.xlu0 %1319 }
 0xdea   :  { %2805 = vrcp.f32 %v1320_v1  ;;  %v2680_v1 = vld [vmem:[%s3520_s6 + $0x10] sm:$0xff] }
 0xdeb   :  { %2807 = vpow2.f32 %v1644_v0 }
 0xdee   :  { %v1493_v11 = vpop.xlane.xlu2 %1492 }
 0xdef   :  { %2809 = vrcp.f32 %v1493_v11 }
 0xdf0   :  { %v2806_v41 = vpop.eup %2805 }
 0xdf1   :  { %v2808_v5 = vpop.eup %2807  ;;  %v1378_v6 = vmul.f32 %v2806_v41, %v3308_v10 }
 0xdf2   :  { %2511 = vmatmul.msk.f32.vlgmr.msrb.gmra.mxu0 %vm187_vm3, %v2808_v5  ;;  %v1649_v7 = vsel %vm187_vm3, %v2808_v5, 0.0 }
 0xdf3   :  { %v1380_v8 = vpack.c.bf16 %v1379_v27, %v1378_v6  ;;  %1650 = vadd.xlane.f32.xlu2 %v1649_v7 }
 0xdf5   :  { %2497 = vmatmul.msk.bf16.vlgmr.msrb.gmra.mxu2 %vm187_vm3, %v1380_v8  ;;  %v2810_v10 = vpop.eup %2809 }
 0xdf6   :  { %v1648_v12 = vpop.xlane.xlu2 %1647  ;;  %v1551_v18 = vmul.f32 %v2810_v10, %v1522_v45 }
 0xe2b   :  { %v1496_v16 = vpop.xlane.xlu2 %1495 }
 0xe2c   :  { %2811 = vrcp.f32 %v1496_v16 }
 0xe2d   :  { %2813 = vrcp.f32 %v1648_v12 }
 0xe32   :  { %v2812_v15 = vpop.eup %2811 }
 0xe33   :  { %v2814_v29 = vpop.eup %2813 }
 0xe3a   :  { %v1548_v17 = vpop.f32.mrf.mxu3 }
 0xe3b   :  { %v1552_v19 = vmul.f32 %v2812_v15, %v1548_v17  ;;  %v2733_v17 = vld [vmem:[%s3526_s12 + $0x10] ss:$0 sm:$0xff] }
 0xe3d   :  { %v1553_v20 = vpack.c.bf16 %v1552_v19, %v1551_v18 }
 0xe3f   :  { %2505 = vmatmul.msk.bf16.vlgmr.msra.gmra.mxu2 %vm187_vm3, %v1553_v20 }
 0xe43   :  { %v1677_v26 = vpop.f32.mrf.mxu3 }
 0xe44   :  { %v1706_v36 = vmul.f32 %v2814_v29, %v1677_v26 }
 0xe66   :  { %v1651_v25 = vpop.xlane.xlu2 %1650 }
 0xe67   :  { %2815 = vrcp.f32 %v1651_v25 }
 0xe6d   :  { %v2816_v31 = vpop.eup %2815 }
 0xe6f   :  { %v1703_v35 = vpop.f32.mrf.mxu0 }
 0xe70   :  { %v1707_v37 = vmul.f32 %v2816_v31, %v1703_v35 }
 0xe72   :  { %v1708_v38 = vpack.c.bf16 %v1707_v37, %v1706_v36  ;;  %v2685_v36 = vld [vmem:[%s3521_s7 + $0x38] sm:$0xff]  ;;  %v2684_v37 = vld [vmem:[%s3521_s7 + $0x30] sm:$0xff] }
 0xe73   :  { %1874 = vmatpush.bf16.msrb.mxu2 %v2685_v36 }
 0xe74   :  { %2512 = vmatmul.msk.bf16.vlgmr.msrb.gmra.mxu1 %vm187_vm3, %v1708_v38  ;;  %v2683_v38 = vld [vmem:[%s3521_s7 + $0x28] sm:$0xff] }
 0xe77   :  { %1875 = vmatpush.bf16.msrb.mxu2 %v2684_v37 }
 0xe78   :  { %v1396_v39 = vpop.f32.mrf.mxu2 }
 0xe79   :  { %v1417_v30 = vadd.f32 %v3316_v21, %v1396_v39  ;;  %v2682_v39 = vld [vmem:[%s3521_s7 + $0x20] sm:$0xff] }
 0xe7b   :  { %1876 = vmatpush.bf16.msrb.mxu2 %v2683_v38 }
 0xe7f   :  { %1877 = vmatpush.bf16.msrb.mxu2 %v2682_v39 }
 0xe80   :  { %v1398_v34 = vpop.f32.mrf.mxu2 }
 0xe81   :  { %v1419_v28 = vadd.f32 %v3318_v22, %v1398_v34 }
 0xec2   :  { %v1569_v40 = vpop.f32.mrf.mxu2 }
 0xec3   :  { %v1574_v42 = vadd.f32 %v1569_v40, %v1417_v30  ;;  %v2735_v40 = vld [vmem:[%s3525_s11 + $0x1] ss:$0 sm:$0xff] }
 0xeca   :  { %v1571_v48 = vpop.f32.mrf.mxu2 }
 0xecb   :  { %v1575_v50 = vadd.f32 %v1571_v48, %v1419_v28  ;;  %v2687_v48 = vld [vmem:[%s3522_s8 + $0x18] sm:$0xff]  ;;  %v2686_v28 = vld [vmem:[%s3522_s8 + $0x10] sm:$0xff] }
 0xecc   :  { %1919 = vmatpush.bf16.msra.mxu0 %v2687_v48 }
 0xed0   :  { %1920 = vmatpush.bf16.msra.mxu0 %v2686_v28 }
 0xef1   :  { %v1724_v45 = vpop.f32.mrf.mxu1 }
 0xef2   :  { %v1729_v46 = vadd.f32 %v1724_v45, %v1574_v42 }
 0xef4   :  { %v1733_v47 = vadd.f32 %v2732_v44, %v1729_v46 }
 0xef6   :  { %v1735_v49 = vadd.f32 %v1733_v47, %v3224_v3 }
 0xef8   :  { %v1739_v51 = vsel %vm142_vm2, %v1735_v49, 0.0 }
 0xef9   :  { %v1726_v13 = vpop.f32.mrf.mxu1  ;;  %1740 = vadd.xlane.f32.xlu0 %v1739_v51 }
 0xefa   :  { %v1730_v52 = vadd.f32 %v1726_v13, %v1575_v50  ;;  %v2736_v50 = vld [vmem:[%s3526_s12 + $0xe] ss:$0 sm:$0xff] }
 0xefc   :  { %v1734_v21 = vadd.f32 %v2732_v44, %v1730_v52 }
 0xefe   :  { %v1736_v53 = vadd.f32 %v1734_v21, %v3226_v4 }
 0xf00   :  { %v1742_v54 = vsel %vm142_vm2, %v1736_v53, 0.0 }
 0xf01   :  { %1743 = vadd.xlane.f32.xlu2 %v1742_v54 }
 0xf19   :  { %1906 = vrot.lane.b32.xlu2 %v3091_v33, %s2861_s2  ;;  %v2681_v33 = vld [vmem:[%s3520_s6 + $0x18] sm:$0xff] }
 0xf1a   :  { %1821 = vmatpush.bf16.msra.mxu3 %v2681_v33 }
 0xf1e   :  { %1822 = vmatpush.bf16.msra.mxu3 %v2680_v1 }
 0xf6c   :  { %v1741_v56 = vpop.xlane.xlu0 %1740 }
 0xf6d   :  { %v1745_v22 = vmul.f32 %v1741_v56, %v3148_v14 }
 0xf6f   :  { %v1747_v57 = vsub.f32 %v1735_v49, %v1745_v22  ;;  %v2737_v22 = vld [vmem:[%s3526_s12 + $0xf] ss:$0 sm:$0xff] }
 0xf71   :  { %v1749_v3 = vmul.f32 %v1747_v57, %v1747_v57 }
 0xf73   :  { %v1751_v58 = vsel %vm142_vm2, %v1749_v3, 0.0 }
 0xf74   :  { %1752 = vadd.xlane.f32.xlu1 %v1751_v58  ;;  %v1744_v55 = vpop.xlane.xlu2 %1743 }
 0xf75   :  { %v1746_v59 = vmul.f32 %v1744_v55, %v3148_v14 }
 0xf77   :  { %v1748_v60 = vsub.f32 %v1736_v53, %v1746_v59 }
 0xf79   :  { %v1750_v61 = vmul.f32 %v1748_v60, %v1748_v60 }
 0xf7b   :  { %v1754_v4 = vsel %vm142_vm2, %v1750_v61, 0.0 }
 0xf7c   :  { %1755 = vadd.xlane.f32.xlu0 %v1754_v4  ;;  %v1907_v54 = vpop.permute.xlu2 %1906 }
 0xf8d   :  { %1904 = vrot.lane.b32.xlu1 %v3089_v32, %s2861_s2 }
 0xfe7   :  { %v1753_v62 = vpop.xlane.xlu1 %1752 }
 0xfe8   :  { %v1757_v63 = vmul.f32 %v1753_v62, %v3148_v14 }
 0xfea   :  { %v1759_v0 = vadd.f32 1e-05, %v1757_v63 }
 0xfec   :  { %2817 = vrsqrt.f32 %v1759_v0  ;;  %vm1767_vm4 = vweird.f32 %v1759_v0 }
 0xfef   :  { %v1756_v2 = vpop.xlane.xlu0 %1755 }
 0xff0   :  { %v1758_v41 = vmul.f32 %v1756_v2, %v3148_v14 }
 0xff2   :  { %v2818_v5 = vpop.eup %2817  ;;  %v1760_v32 = vadd.f32 1e-05, %v1758_v41 }
 0xff3   :  { %v1762_v27 = vmul.f32 %v2818_v5, %v1759_v0  ;;  %vm1768_vm3 = vweird.f32 %v2818_v5 }
 0xff4   :  { %2819 = vrsqrt.f32 %v1760_v32  ;;  %vm1769_vm7 = vmor %vm1767_vm4, %vm1768_vm3  ;;  %vm1777_vm9 = vweird.f32 %v1760_v32 }
 0xff5   :  { %v1763_v6 = vmul.f32 %v2818_v5, %v1762_v27 }
 0xff7   :  { %v1764_v7 = vmul.f32 0.5, %v1763_v6 }
 0xff9   :  { %v1765_v8 = vsub.f32 1.5, %v1764_v7 }
 0xffa   :  { %v2820_v9 = vpop.eup %2819 }
 0xffb   :  { %v1766_v43 = vmul.f32 %v2818_v5, %v1765_v8  ;;  %v1772_v11 = vmul.f32 %v2820_v9, %v1760_v32  ;;  %vm1778_vm8 = vweird.f32 %v2820_v9 }
 0xffc   :  { %vm1779_vm10 = vmor %vm1777_vm9, %vm1778_vm8  ;;  %vm2071_vm8 = vcmask 1041409  }
 0xffd   :  { %v1773_v12 = vmul.f32 %v2820_v9, %v1772_v11  ;;  %v1770_v16 = vsel %vm1769_vm7, %v2818_v5, %v1766_v43 }
 0xffe   :  { %v1781_v18 = vmul.f32 %v1770_v16, %v1747_v57 }
 0xfff   :  { %v1774_v10 = vmul.f32 0.5, %v1773_v12  ;;  %v1905_v3 = vpop.permute.xlu1 %1904 }
0x1000   :  { %v1784_v24 = vmul.f32 %v2733_v17, %v1781_v18 }
0x1001   :  { %v1775_v15 = vsub.f32 1.5, %v1774_v10 }
0x1002   :  { %v1787_v29 = vadd.f32 %v2734_v23, %v1784_v24  ;;  %v2738_v24 = vld [vmem:[%s3526_s12 + $0x12] ss:$0 sm:$0xff] }
0x1003   :  { %v1776_v19 = vmul.f32 %v2820_v9, %v1775_v15 }
0x1005   :  { %v1780_v20 = vsel %vm1779_vm10, %v2820_v9, %v1776_v19 }
0x1006   :  { %v1782_v25 = vmul.f32 %v1780_v20, %v1748_v60 }
0x1008   :  { %v1785_v26 = vmul.f32 %v2733_v17, %v1782_v25 }
0x100a   :  { %v1788_v31 = vadd.f32 %v2734_v23, %v1785_v26 }
0x100c   :  { %v1789_v35 = vpack.c.bf16 %v1788_v31, %v1787_v29 }
0x100e   :  { %2526 = vmatmul.msk.bf16.vlgmr.msra.gmra.mxu3 %vm142_vm2, %v1789_v35 }
0x1091   :  { %v1824_v34 = vpop.f32.mrf.mxu3 }
0x1092   :  { %v1825_v30 = vadd.f32 %v2735_v40, %v1824_v34 }
0x1094   :  { %v1829_v45 = vmax.f32 %v1825_v30, 0.0 }
0x1099   :  { %v1826_v42 = vpop.f32.mrf.mxu3 }
0x109a   :  { %v1827_v44 = vadd.f32 %v2735_v40, %v1826_v42 }
0x109c   :  { %v1830_v46 = vmax.f32 %v1827_v44, 0.0 }
0x109e   :  { %v1831_v47 = vpack.c.bf16 %v1830_v46, %v1829_v45 }
0x10a0   :  { %2551 = vmatmul.msk.bf16.vlgmr.msrb.gmra.mxu2 %vm943_vm13, %v1831_v47 }
0x1123   :  { %v1879_v49 = vpop.f32.mrf.mxu2 }
0x1124   :  { %v1880_v13 = vadd.f32 %v2736_v50, %v1879_v49 }
0x112b   :  { %v1881_v51 = vpop.f32.mrf.mxu2 }
0x112c   :  { %v1882_v52 = vadd.f32 %v2736_v50, %v1881_v51 }
0x112e   :  { %v1884_v21 = vpack.c.bf16 %v1882_v52, %v1880_v13 }
0x1130   :  { %2564 = vmatmul.msk.bf16.vlgmr.msra.gmra.mxu0 %vm142_vm2, %v1884_v21 }
0x11ad   :  { %v1922_v53 = vpop.f32.mrf.mxu0 }
0x11ae   :  { %v1923_v58 = vadd.f32 %v1922_v53, %v1905_v3 }
0x11b0   :  { %v1929_v60 = vadd.f32 %v2737_v22, %v1923_v58 }
0x11b2   :  { %v1931_v4 = vadd.f32 %v1929_v60, %v1787_v29 }
0x11b4   :  { %v1935_v33 = vsel %vm142_vm2, %v1931_v4, 0.0 }
0x11b5   :  { %v1924_v56 = vpop.f32.mrf.mxu0 }
0x11b6   :  { %v1925_v57 = vadd.f32 %v1924_v56, %v1907_v54 }
0x11b8   :  { %v1930_v55 = vadd.f32 %v2737_v22, %v1925_v57 }
0x11ba   :  { %v1932_v59 = vadd.f32 %v1930_v55, %v1788_v31  ;;  %v2739_v31 = vld [vmem:[%s3526_s12 + $0x13] ss:$0 sm:$0xff] }
0x11bc   :  { %v1938_v61 = vsel %vm142_vm2, %v1932_v59, 0.0 }
0x11bd   :  { %1939 = vadd.xlane.f32.xlu0 %v1938_v61 }
0x11c5   :  { %1936 = vadd.xlane.f32.xlu0 %v1935_v33 }
0x1230   :  { %v1940_v62 = vpop.xlane.xlu0 %1939 }
0x1231   :  { %v1942_v63 = vmul.f32 %v1940_v62, %v3148_v14 }
0x1233   :  { %v1944_v0 = vsub.f32 %v1932_v59, %v1942_v63  ;;  %v2740_v63 = vld [vmem:[%s3526_s12 + $0x14] ss:$0 sm:$0xff] }
0x1235   :  { %v1946_v1 = vmul.f32 %v1944_v0, %v1944_v0 }
0x1237   :  { %v1950_v2 = vsel %vm142_vm2, %v1946_v1, 0.0 }
0x1238   :  { %1951 = vadd.xlane.f32.xlu0 %v1950_v2  ;;  %v1937_v41 = vpop.xlane.xlu0 %1936 }
0x1239   :  { %v1941_v5 = vmul.f32 %v1937_v41, %v3148_v14 }
0x123b   :  { %v1943_v32 = vsub.f32 %v1931_v4, %v1941_v5 }
0x123d   :  { %v1945_v27 = vmul.f32 %v1943_v32, %v1943_v32 }
0x123f   :  { %v1947_v6 = vsel %vm142_vm2, %v1945_v27, 0.0 }
0x1240   :  { %1948 = vadd.xlane.f32.xlu2 %v1947_v6 }
0x12ab   :  { %v1952_v7 = vpop.xlane.xlu0 %1951 }
0x12ac   :  { %v1954_v8 = vmul.f32 %v1952_v7, %v3148_v14  ;;  %v2691_v7 = vld [vmem:[%s3524_s10 + $0x18] sm:$0xff] }
0x12ad   :  { %2095 = vmatpush.bf16.msra.mxu1 %v2691_v7 }
0x12ae   :  { %v1956_v9 = vadd.f32 1e-05, %v1954_v8  ;;  %v2693_v8 = vld [vmem:[%s3524_s10 + $0x28] sm:$0xff] }
0x12af   :  { %2163 = vmatpush.bf16.msra.mxu2 %v2693_v8 }
0x12b0   :  { %2821 = vrsqrt.f32 %v1956_v9  ;;  %vm1973_vm12 = vweird.f32 %v1956_v9 }
0x12b3   :  { %v1949_v43 = vpop.xlane.xlu2 %1948 }
0x12b4   :  { %v1953_v11 = vmul.f32 %v1949_v43, %v3148_v14 }
0x12b6   :  { %v2822_v12 = vpop.eup %2821  ;;  %v1955_v16 = vadd.f32 1e-05, %v1953_v11  ;;  %v2688_v11 = vld [vmem:[%s3524_s10] sm:$0xff] }
0x12b7   :  { %v1968_v10 = vmul.f32 %v2822_v12, %v1956_v9  ;;  %vm1974_vm11 = vweird.f32 %v2822_v12  ;;  %v2695_v9 = vld [vmem:[%s3524_s10 + $0x38] sm:$0xff] }
0x12b8   :  { %2823 = vrsqrt.f32 %v1955_v16  ;;  %vm1975_vm13 = vmor %vm1973_vm12, %vm1974_vm11  ;;  %vm1963_vm15 = vweird.f32 %v1955_v16  ;;  %2201 = vmatpush.bf16.msrb.mxu0 %v2695_v9 }
0x12b9   :  { %v1969_v15 = vmul.f32 %v2822_v12, %v1968_v10  ;;  %v2692_v10 = vld [vmem:[%s3524_s10 + $0x20] sm:$0xff] }
0x12ba   :  { %2164 = vmatpush.bf16.msra.mxu2 %v2692_v10 }
0x12bb   :  { %v1970_v17 = vmul.f32 0.5, %v1969_v15 }
0x12bd   :  { %v1971_v18 = vsub.f32 1.5, %v1970_v17  ;;  %v2694_v17 = vld [vmem:[%s3524_s10 + $0x30] sm:$0xff] }
0x12be   :  { %v2824_v19 = vpop.eup %2823  ;;  %2202 = vmatpush.bf16.msrb.mxu0 %v2694_v17 }
0x12bf   :  { %v1972_v20 = vmul.f32 %v2822_v12, %v1971_v18  ;;  %v1958_v23 = vmul.f32 %v2824_v19, %v1955_v16  ;;  %vm1964_vm14 = vweird.f32 %v2824_v19  ;;  %v2690_v16 = vld [vmem:[%s3524_s10 + $0x10] sm:$0xff] }
0x12c0   :  { %vm1965_vm0 = vmor %vm1963_vm15, %vm1964_vm14  ;;  %2096 = vmatpush.bf16.msra.mxu1 %v2690_v16 }
0x12c1   :  { %v1959_v25 = vmul.f32 %v2824_v19, %v1958_v23  ;;  %v1976_v26 = vsel %vm1975_vm13, %v2822_v12, %v1972_v20 }
0x12c2   :  { %v1978_v29 = vmul.f32 %v1976_v26, %v1944_v0  ;;  %v2699_v26 = vld [vmem:[%s3524_s10 + $0x58] sm:$0xff] }
0x12c3   :  { %v1960_v35 = vmul.f32 0.5, %v1959_v25 }
0x12c4   :  { %v1981_v36 = vmul.f32 %v2738_v24, %v1978_v29  ;;  %v2697_v29 = vld [vmem:[%s3524_s10 + $0x48] sm:$0xff] }
0x12c5   :  { %v1961_v37 = vsub.f32 1.5, %v1960_v35  ;;  %2239 = vmatpush.bf16.msrb.mxu1 %v2697_v29 }
0x12c6   :  { %v1984_v38 = vadd.f32 %v2739_v31, %v1981_v36 }
0x12c7   :  { %v1962_v39 = vmul.f32 %v2824_v19, %v1961_v37  ;;  %v2703_v37 = vld [vmem:[%s3524_s10 + $0x78] sm:$0xff] }
0x12c8   :  { %v1990_v34 = vsel %vm142_vm2, %v1984_v38, 0.0  ;;  %2353 = vmatpush.bf16.msra.mxu0 %v2703_v37 }
0x12c9   :  { %1991 = vadd.xlane.f32.xlu1 %v1990_v34  ;;  %v1966_v40 = vsel %vm1965_vm0, %v2824_v19, %v1962_v39  ;;  %v2696_v39 = vld [vmem:[%s3524_s10 + $0x40] sm:$0xff] }
0x12ca   :  { %v1977_v30 = vmul.f32 %v1966_v40, %v1943_v32  ;;  %v2689_v32 = vld [vmem:[%s3524_s10 + $0x8] sm:$0xff]  ;;  %v2700_v40 = vld [vmem:[%s3524_s10 + $0x60] sm:$0xff]  ;;  %2240 = vmatpush.bf16.msrb.mxu1 %v2696_v39 }
0x12cb   :  { %2126 = vmatpush.bf16.msrb.mxu3 %v2689_v32 }
0x12cc   :  { %v1980_v42 = vmul.f32 %v2738_v24, %v1977_v30  ;;  %v2702_v30 = vld [vmem:[%s3524_s10 + $0x70] sm:$0xff] }
0x12cd   :  { %2354 = vmatpush.bf16.msra.mxu0 %v2702_v30  ;;  %v2742_v30 = vld [vmem:[%s3526_s12 + $0x16] ss:$0 sm:$0xff] }
0x12ce   :  { %v1983_v44 = vadd.f32 %v2739_v31, %v1980_v42  ;;  %v2701_v31 = vld [vmem:[%s3524_s10 + $0x68] sm:$0xff] }
0x12cf   :  { %2127 = vmatpush.bf16.msrb.mxu3 %v2688_v11  ;;  %2315 = vmatpush.bf16.msrb.mxu2 %v2701_v31 }
0x12d0   :  { %v1987_v45 = vsel %vm142_vm2, %v1983_v44, 0.0 }
0x12d1   :  { %1988 = vadd.xlane.f32.xlu0 %v1987_v45 }
0x12d3   :  { %2277 = vmatpush.bf16.msra.mxu3 %v2699_v26  ;;  %2316 = vmatpush.bf16.msrb.mxu2 %v2700_v40 }
0x133c   :  { %v1992_v46 = vpop.xlane.xlu1 %1991 }
0x133d   :  { %v1994_v47 = vmul.f32 %v1992_v46, %v3148_v14 }
0x133f   :  { %v1996_v48 = vsub.f32 %v1984_v38, %v1994_v47  ;;  %v2698_v38 = vld [vmem:[%s3524_s10 + $0x50] sm:$0xff] }
0x1340   :  { %2278 = vmatpush.bf16.msra.mxu3 %v2698_v38 }
0x1341   :  { %v1998_v28 = vmul.f32 %v1996_v48, %v1996_v48 }
0x1343   :  { %v2002_v49 = vsel %vm142_vm2, %v1998_v28, 0.0 }
0x1344   :  { %2003 = vadd.xlane.f32.xlu0 %v2002_v49  ;;  %v1989_v50 = vpop.xlane.xlu0 %1988 }
0x1345   :  { %v1993_v51 = vmul.f32 %v1989_v50, %v3148_v14 }
0x1347   :  { %v1995_v13 = vsub.f32 %v1983_v44, %v1993_v51 }
0x1349   :  { %v1997_v52 = vmul.f32 %v1995_v13, %v1995_v13 }
0x134b   :  { %v1999_v21 = vsel %vm142_vm2, %v1997_v52, 0.0 }
0x134c   :  { %2000 = vadd.xlane.f32.xlu0 %v1999_v21 }
0x13b7   :  { %v2004_v53 = vpop.xlane.xlu0 %2003 }
0x13b8   :  { %v2006_v54 = vmul.f32 %v2004_v53, %v3148_v14 }
0x13ba   :  { %v2008_v56 = vadd.f32 1e-05, %v2006_v54 }
0x13bc   :  { %2825 = vrsqrt.f32 %v2008_v56  ;;  %vm2025_vm5 = vweird.f32 %v2008_v56 }
0x13bf   :  { %v2001_v22 = vpop.xlane.xlu0 %2000 }
0x13c0   :  { %v2005_v57 = vmul.f32 %v2001_v22, %v3148_v14  ;;  %v2741_v14 = vld [vmem:[%s3526_s12 + $0x15] ss:$0 sm:$0xff] }
0x13c2   :  { %v2826_v3 = vpop.eup %2825  ;;  %v2007_v58 = vadd.f32 1e-05, %v2005_v57 }
0x13c3   :  { %v2020_v55 = vmul.f32 %v2826_v3, %v2008_v56  ;;  %vm2026_vm1 = vweird.f32 %v2826_v3 }
0x13c4   :  { %2827 = vrsqrt.f32 %v2007_v58  ;;  %vm2027_vm6 = vmor %vm2025_vm5, %vm2026_vm1  ;;  %vm2015_vm4 = vweird.f32 %v2007_v58 }
0x13c5   :  { %v2021_v59 = vmul.f32 %v2826_v3, %v2020_v55 }
0x13c7   :  { %v2022_v60 = vmul.f32 0.5, %v2021_v59 }
0x13c9   :  { %v2023_v61 = vsub.f32 1.5, %v2022_v60 }
0x13ca   :  { %v2828_v4 = vpop.eup %2827 }
0x13cb   :  { %v2024_v33 = vmul.f32 %v2826_v3, %v2023_v61  ;;  %v2010_v62 = vmul.f32 %v2828_v4, %v2007_v58  ;;  %vm2016_vm3 = vweird.f32 %v2828_v4 }
0x13cc   :  { %vm2017_vm7 = vmor %vm2015_vm4, %vm2016_vm3 }
0x13cd   :  { %v2028_v0 = vsel %vm2027_vm6, %v2826_v3, %v2024_v33  ;;  %v2011_v1 = vmul.f32 %v2828_v4, %v2010_v62 }
0x13ce   :  { %v2030_v2 = vmul.f32 %v2028_v0, %v1996_v48 }
0x13cf   :  { %v2012_v41 = vmul.f32 0.5, %v2011_v1 }
0x13d0   :  { %v2033_v5 = vmul.f32 %v2740_v63, %v2030_v2 }
0x13d1   :  { %v2013_v27 = vsub.f32 1.5, %v2012_v41 }
0x13d2   :  { %v2036_v6 = vadd.f32 %v2741_v14, %v2033_v5 }
0x13d3   :  { %v2014_v43 = vmul.f32 %v2828_v4, %v2013_v27 }
0x13d4   :  { %v2040_v12 = vmul.f32 0.044715, %v2036_v6  ;;  %v2038_v47 = vmul.f32 0.5, %v2036_v6 }
0x13d5   :  { %v2018_v15 = vsel %vm2017_vm7, %v2828_v4, %v2014_v43 }
0x13d6   :  { %v2042_v18 = vmul.f32 %v2040_v12, %v2036_v6  ;;  %v2029_v19 = vmul.f32 %v2018_v15, %v1995_v13 }
0x13d8   :  { %v2044_v20 = vmul.f32 %v2042_v18, %v2036_v6  ;;  %v2032_v23 = vmul.f32 %v2740_v63, %v2029_v19 }
0x13da   :  { %v2046_v24 = vadd.f32 %v2044_v20, %v2036_v6  ;;  %v2035_v25 = vadd.f32 %v2741_v14, %v2032_v23 }
0x13dc   :  { %v2048_v35 = vmul.f32 0.7978846, %v2046_v24  ;;  %v2039_v36 = vmul.f32 0.044715, %v2035_v25  ;;  %v2037_v51 = vmul.f32 0.5, %v2035_v25 }
0x13de   :  { %2829 = vtanh.f32 %v2048_v35  ;;  %v2041_v34 = vmul.f32 %v2039_v36, %v2035_v25 }
0x13e0   :  { %v2043_v42 = vmul.f32 %v2041_v34, %v2035_v25 }
0x13e2   :  { %v2045_v44 = vadd.f32 %v2043_v42, %v2035_v25 }
0x13e4   :  { %v2830_v45 = vpop.eup %2829  ;;  %v2047_v46 = vmul.f32 0.7978846, %v2045_v44 }
0x13e5   :  { %v2052_v48 = vadd.f32 1.0, %v2830_v45 }
0x13e6   :  { %2831 = vtanh.f32 %v2047_v46 }
0x13e7   :  { %v2054_v28 = vmul.f32 %v2052_v48, %v2038_v47 }
0x13e9   :  { %v2056_v49 = vpack.c.bf16 %v2054_v28, %v2054_v28 }
0x13eb   :  { %v2069_v52 = vunpack.c.l.b16 %v2056_v49 }
0x13ec   :  { %v2832_v50 = vpop.eup %2831 }
0x13ed   :  { %v2051_v13 = vadd.f32 1.0, %v2832_v50  ;;  %v2102_v56 = vrot.slane %v2069_v52, 7  ;;  %v2139_v22 = vrot.slane %v2069_v52, 1  ;;  %v2177_v57 = vrot.slane %v2069_v52, 2 }
0x13ee   :  { %v2253_v14 = vrot.slane %v2069_v52, 4  ;;  %v2215_v27 = vrot.slane %v2069_v52, 3  ;;  %v2291_v6 = vrot.slane %v2069_v52, 5  ;;  %v2329_v7 = vrot.slane %v2069_v52, 6 }
0x13ef   :  { %v2053_v21 = vmul.f32 %v2051_v13, %v2037_v51 }
0x13f1   :  { %v2055_v53 = vpack.c.bf16 %v2053_v21, %v2053_v21 }
0x13f3   :  { %v2068_v54 = vunpack.c.l.b16 %v2055_v53 }
0x13f5   :  { %v2103_v3 = vsel %vm2071_vm8, %v2102_v56, %v2068_v54  ;;  %v2070_v58 = vrot.slane %v2068_v54, 1  ;;  %v2138_v55 = vrot.slane %v2068_v54, 2  ;;  %v2176_v59 = vrot.slane %v2068_v54, 3 }
0x13f6   :  { %v2104_v60 = vpack.c.b16 %v2103_v3, %v2103_v3  ;;  %v2252_v1 = vrot.slane %v2068_v54, 5  ;;  %v2214_v2 = vrot.slane %v2068_v54, 4  ;;  %v2290_v41 = vrot.slane %v2068_v54, 6 }
0x13f7   :  { %v2072_v61 = vsel %vm2071_vm8, %v2069_v52, %v2070_v58  ;;  %v2140_v4 = vsel %vm2071_vm8, %v2139_v22, %v2138_v55  ;;  %v2178_v33 = vsel %vm2071_vm8, %v2177_v57, %v2176_v59  ;;  %v2328_v5 = vrot.slane %v2068_v54, 7 }
0x13f8   :  { %2586 = vmatmul.msk.bf16.vlgmr.msrb.gmra.mxu3 %vm142_vm2, %v2104_v60  ;;  %v2073_v62 = vpack.c.b16 %v2072_v61, %v2072_v61  ;;  %v2141_v63 = vpack.c.b16 %v2140_v4, %v2140_v4  ;;  %v2179_v0 = vpack.c.b16 %v2178_v33, %v2178_v33  ;;  %v2254_v32 = vsel %vm2071_vm8, %v2253_v14, %v2252_v1 }
0x13f9   :  { %v2216_v8 = vsel %vm2071_vm8, %v2215_v27, %v2214_v2  ;;  %v2292_v9 = vsel %vm2071_vm8, %v2291_v6, %v2290_v41  ;;  %v2255_v43 = vpack.c.b16 %v2254_v32, %v2254_v32  ;;  %v2330_v11 = vsel %vm2071_vm8, %v2329_v7, %v2328_v5 }
0x13fa   :  { %2577 = vmatmul.msk.bf16.vlgmr.msra.gmra.mxu1 %vm142_vm2, %v2073_v62  ;;  %2599 = vmatmul.msk.bf16.vlgmr.msra.gmra.mxu2 %vm142_vm2, %v2141_v63  ;;  %v2217_v12 = vpack.c.b16 %v2216_v8, %v2216_v8  ;;  %v2293_v16 = vpack.c.b16 %v2292_v9, %v2292_v9  ;;  %v2331_v10 = vpack.c.b16 %v2330_v11, %v2330_v11 }
0x13fb   :  { %2612 = vmatmul.msk.bf16.vlgmr.msrb.gmra.mxu0 %vm142_vm2, %v2179_v0 }
0x1408   :  { %2638 = vmatmul.msk.bf16.vlgmr.msra.gmra.mxu3 %vm142_vm2, %v2255_v43 }
0x140a   :  { %2625 = vmatmul.msk.bf16.vlgmr.msrb.gmra.mxu1 %vm142_vm2, %v2217_v12  ;;  %2651 = vmatmul.msk.bf16.vlgmr.msrb.gmra.mxu2 %vm142_vm2, %v2293_v16 }
0x140b   :  { %2664 = vmatmul.msk.bf16.vlgmr.msra.gmra.mxu0 %vm142_vm2, %v2331_v10  ;;  %vm2364_vm2 = vcmask 58368  }
0x1477   :  { %v2098_v15 = vpop.f32.mrf.mxu1 }
0x1478   :  { %v2204_v17 = vpop.f32.mrf.mxu0 }
0x147b   :  { %v2129_v18 = vpop.f32.mrf.mxu3 }
0x147c   :  { %v2130_v23 = vadd.f32 %v2129_v18, %v2098_v15 }
0x147d   :  { %v2166_v19 = vpop.f32.mrf.mxu2 }
0x147e   :  { %v2170_v26 = vadd.f32 %v2166_v19, %v2130_v23 }
0x147f   :  { %v2100_v20 = vpop.f32.mrf.mxu1 }
0x1480   :  { %v2206_v24 = vpop.f32.mrf.mxu0  ;;  %v2208_v35 = vadd.f32 %v2204_v17, %v2170_v26 }
0x1483   :  { %v2131_v25 = vpop.f32.mrf.mxu3 }
0x1485   :  { %v2168_v29 = vpop.f32.mrf.mxu2 }
0x1487   :  { %v2242_v31 = vpop.f32.mrf.mxu1 }
0x1488   :  { %v2356_v36 = vpop.f32.mrf.mxu0  ;;  %v2246_v37 = vadd.f32 %v2242_v31, %v2208_v35 }
0x148b   :  { %v2280_v38 = vpop.f32.mrf.mxu3 }
0x148c   :  { %v2284_v39 = vadd.f32 %v2280_v38, %v2246_v37 }
0x148d   :  { %v2318_v34 = vpop.f32.mrf.mxu2 }
0x148e   :  { %v2322_v40 = vadd.f32 %v2318_v34, %v2284_v39 }
0x148f   :  { %v2244_v42 = vpop.f32.mrf.mxu1 }
0x1490   :  { %v2360_v44 = vadd.f32 %v2356_v36, %v2322_v40  ;;  %v2358_v45 = vpop.f32.mrf.mxu0 }
0x1492   :  { %v2363_v46 = vadd.f32 %v2742_v30, %v2360_v44 }
0x1493   :  { %v2282_v47 = vpop.f32.mrf.mxu3 }
0x1494   :  { %2365 = vst.msk [vmem:[#allocation2] sm:$0x3] %vm2364_vm2, %v2363_v46 }
0x1495   :  { %v2320_v48 = vpop.f32.mrf.mxu2  ;;  %2376 = dma.vmem_to_hbm [thread:$0]  %s2372_s22, 32, %s2374_s25, [#allocation3]  }
0x1496   :  { %2857 = dma.done.wait [#allocation3], 32  }
0x1497   :  { %2858 = vsyncadd [#allocation3], 4294967264 }
0x1498   :  { %2381 = vsyncpa [#allocation3], 1 }

</bundles_post_ra>
